<compile_context>
chip_gen: v6e
topology: v6e:2x2x1
jax: 0.10.0
libtpu: 0.0.40
codegen_flags: <defaults>
</compile_context>

<pallas_src>
import functools

import jax
import jax.numpy as jnp
from jax.experimental import pallas as pl
from jax.experimental.pallas import tpu as pltpu


# ----------------------------- fused network kernel --------------------------

def _fused_lstm_fc_kernel(buf_ref, out_ref, xp_ref, seq_ref, *,
                          T, B, H, C, d_in, num_layers,
                          x_off, layer_offs, fc_w_off, fc_b_off):
    """Whole forward pass (all layers, both directions, FC) in one kernel.

    buf_ref : (R, 8H) packed f32 buffer holding, at static row offsets:
                x_flat (T*B, d_in) | per layer: [W_ih_f|W_ih_b] (d_l, 8H),
                [W_hh_f|W_hh_b] (H, 8H), [b_f|b_b] (1, 8H) | fc_w (2H, C),
                fc_b (1, C).
    out_ref : (B, C) logits.
    xp_ref  : (T*B, 8H) VMEM scratch - hoisted input projection of one layer.
    seq_ref : (T*B, 2H) VMEM scratch - previous layer's bidirectional output.
    """
    H4 = 4 * H
    TB = T * B
    B2 = 2 * B

    # Rows [0, B) carry the forward direction, rows [B, 2B) the backward one.
    row_is_fwd = jax.lax.broadcasted_iota(jnp.int32, (B2, H4), 0) < B

    zeros_state = jnp.zeros((B2, H), jnp.float32)
    last_h_f = jnp.zeros((B, H), jnp.float32)
    last_h_b = jnp.zeros((B, H), jnp.float32)

    for layer in range(num_layers):
        ih_off, hh_off, b_off, d_l = layer_offs[layer]
        is_last = layer == num_layers - 1

        # ---- hoisted input projection: ONE matmul for all timesteps --------
        if layer == 0:
            x_all = buf_ref[x_off:x_off + TB, :d_in]          # (T*B, d_in)
        else:
            x_all = seq_ref[...]                               # (T*B, 2H)
        w_ih = buf_ref[ih_off:ih_off + d_l, :]                 # (d_l, 8H)
        bias = buf_ref[b_off:b_off + 1, :]                     # (1, 8H)
        xp_ref[...] = (jnp.dot(x_all, w_ih,
                               preferred_element_type=jnp.float32) + bias)

        w_hh = buf_ref[hh_off:hh_off + H, :]                   # (H, 8H), hoisted

        h = zeros_state                                        # (2B, H) packed
        c = zeros_state

        # Fully unrolled (static) time loop; only K=H matmul on critical path.
        for t in range(T):
            rec = jnp.dot(h, w_hh, preferred_element_type=jnp.float32)  # (2B,8H)
            # Keep fwd rows' fwd-gate block and bwd rows' bwd-gate block
            # (lane-aligned 128-wide halves -> cheap VPU select, no relayout).
            pre = jnp.where(row_is_fwd, rec[:, :H4], rec[:, H4:])       # (2B,4H)

            # Input-projection contributions (independent of the recurrence,
            # so this slab assembly stays off the loop-carried critical path).
            xp_f = xp_ref[t * B:(t + 1) * B, :H4]                        # (B,4H)
            xp_b = xp_ref[(T - 1 - t) * B:(T - t) * B, H4:]              # (B,4H)
            g = pre + jnp.concatenate([xp_f, xp_b], axis=0)              # (2B,4H)

            # PyTorch gate order: i, f, g, o -- computed on the packed block.
            i = jax.nn.sigmoid(g[:, 0 * H:1 * H])
            f = jax.nn.sigmoid(g[:, 1 * H:2 * H])
            gg = jnp.tanh(g[:, 2 * H:3 * H])
            o = jax.nn.sigmoid(g[:, 3 * H:4 * H])
            c = f * c + i * gg
            h = o * jnp.tanh(c)

            if is_last:
                if t == 0:
                    last_h_b = h[B:]          # bwd output at original time T-1
                if t == T - 1:
                    last_h_f = h[:B]          # fwd output at original time T-1
            else:
                # Stash the bidirectional sequence for the next layer:
                # fwd -> lanes [0:H] at time t, bwd -> lanes [H:2H] at T-1-t.
                seq_ref[t * B:(t + 1) * B, :H] = h[:B]
                seq_ref[(T - 1 - t) * B:(T - t) * B, H:] = h[B:]

    # ---- epilogue: out[:, -1, :] -> (Dropout = identity in eval) -> FC -----
    last = jnp.concatenate([last_h_f, last_h_b], axis=-1)               # (B,2H)
    fc_w = buf_ref[fc_w_off:fc_w_off + 2 * H, :C]                        # (2H,C)
    fc_b = buf_ref[fc_b_off:fc_b_off + 1, :C]                            # (1,C)
    out_ref[...] = (jnp.dot(last, fc_w, preferred_element_type=jnp.float32)
                    + fc_b).astype(out_ref.dtype)


# ------------------------------ Model forward --------------------------------

def _pad_rows(a, mult=8):
    pad = (-a.shape[0]) % mult
    return jnp.pad(a, ((0, pad), (0, 0))) if pad else a


def _pad_lanes(a, width):
    pad = width - a.shape[1]
    return jnp.pad(a, ((0, 0), (0, pad))) if pad else a


def emotion_lstm_classifier(x, params):
    """x: (B, T, input_size) batch-first. Returns logits (B, num_classes)."""
    B, T, D = x.shape
    num_layers = len(params["lstm"])
    H = params["lstm"][0]["fwd"]["w_hh_t"].shape[0]
    C = params["fc_w_t"].shape[1]
    LW = 8 * H                      # lane width of the packed buffer (= 256)

    # ---- consolidate x + all weights/biases into ONE packed buffer ----------
    segments, offsets = [], {}
    row = 0

    def add(name, arr):
        nonlocal row
        arr = _pad_rows(_pad_lanes(arr.astype(jnp.float32), LW), 8)
        segments.append(arr)
        offsets[name] = row
        row += arr.shape[0]

    # time-major, flattened input: rows t*B + b hold x[b, t, :]
    x_flat = jnp.transpose(x, (1, 0, 2)).reshape(T * B, D)
    add("x", x_flat)

    layer_offs = []
    for li, lp in enumerate(params["lstm"]):
        w_ih_both = jnp.concatenate([lp["fwd"]["w_ih_t"], lp["bwd"]["w_ih_t"]],
                                    axis=1)                  # (d_l, 8H)
        w_hh_both = jnp.concatenate([lp["fwd"]["w_hh_t"], lp["bwd"]["w_hh_t"]],
                                    axis=1)                  # (H, 8H)
        b_both = jnp.concatenate([lp["fwd"]["b"], lp["bwd"]["b"]], axis=1)
        d_l = w_ih_both.shape[0]
        add(f"w_ih_{li}", w_ih_both)
        add(f"w_hh_{li}", w_hh_both)
        add(f"b_{li}", b_both)
        layer_offs.append((offsets[f"w_ih_{li}"], offsets[f"w_hh_{li}"],
                           offsets[f"b_{li}"], d_l))

    add("fc_w", params["fc_w_t"])                            # (2H, C)
    add("fc_b", params["fc_b"])                              # (1, C)

    buf = jnp.concatenate(segments, axis=0)                  # (R, 8H) f32
    R = buf.shape[0]

    kernel = functools.partial(
        _fused_lstm_fc_kernel, T=T, B=B, H=H, C=C, d_in=D,
        num_layers=num_layers, x_off=offsets["x"], layer_offs=tuple(layer_offs),
        fc_w_off=offsets["fc_w"], fc_b_off=offsets["fc_b"])

    return pl.pallas_call(
        kernel,
        out_shape=jax.ShapeDtypeStruct((B, C), jnp.float32),
        grid=(1,),
        in_specs=[pl.BlockSpec((R, LW), lambda i: (0, 0))],   # single input DMA
        out_specs=pl.BlockSpec((B, C), lambda i: (0, 0)),
        scratch_shapes=[pltpu.VMEM((T * B, 8 * H), jnp.float32),   # xp_ref
                        pltpu.VMEM((T * B, 2 * H), jnp.float32)],  # seq_ref
        compiler_params=pltpu.CompilerParams(
            dimension_semantics=("arbitrary",)),   # recurrence is sequential
    )(buf)


# --------------------------- Deterministic params -----------------------------

def init_params(key, input_size, hidden_size, num_layers, num_classes):
    bound = 1.0 / jnp.sqrt(jnp.float32(hidden_size))
    params = {"lstm": []}
    for layer in range(num_layers):
        d_in = input_size if layer == 0 else 2 * hidden_size
        layer_p = {}
        for direction in ("fwd", "bwd"):
            key, k1, k2, k3, k4 = jax.random.split(key, 5)
            w_ih = jax.random.uniform(k1, (4 * hidden_size, d_in),
                                      minval=-bound, maxval=bound)
            w_hh = jax.random.uniform(k2, (4 * hidden_size, hidden_size),
                                      minval=-bound, maxval=bound)
            b_ih = jax.random.uniform(k3, (4 * hidden_size,),
                                      minval=-bound, maxval=bound)
            b_hh = jax.random.uniform(k4, (4 * hidden_size,),
                                      minval=-bound, maxval=bound)
            layer_p[direction] = {
                "w_ih_t": w_ih.T,                               # (D_in, 4H)
                "w_hh_t": w_hh.T,                               # (H, 4H)
                "b": (b_ih + b_hh).reshape(1, -1),              # (1, 4H)
            }
        params["lstm"].append(layer_p)

    key, k1, k2 = jax.random.split(key, 3)
    fc_bound = 1.0 / jnp.sqrt(jnp.float32(2 * hidden_size))
    w_fc = jax.random.uniform(k1, (num_classes, 2 * hidden_size),
                              minval=-fc_bound, maxval=fc_bound)
    b_fc = jax.random.uniform(k2, (num_classes,),
                              minval=-fc_bound, maxval=fc_bound)
    params["fc_w_t"] = w_fc.T                                   # (2H, C)
    params["fc_b"] = b_fc.reshape(1, -1)                        # (1, C)
    return params


# ------------------------------ Pure-JAX reference ----------------------------

def _ref_lstm_dir(x_tbd, w_ih_t, w_hh_t, b):
    H = w_hh_t.shape[0]
    B = x_tbd.shape[1]

    def step(carry, x_t):
        h, c = carry
        gates = x_t @ w_ih_t + h @ w_hh_t + b
        i = jax.nn.sigmoid(gates[:, :H])
        f = jax.nn.sigmoid(gates[:, H:2 * H])
        g = jnp.tanh(gates[:, 2 * H:3 * H])
        o = jax.nn.sigmoid(gates[:, 3 * H:])
        c = f * c + i * g
        h = o * jnp.tanh(c)
        return (h, c), h

    init = (jnp.zeros((B, H), jnp.float32), jnp.zeros((B, H), jnp.float32))
    _, hs = jax.lax.scan(step, init, x_tbd)
    return hs


def _ref_forward(x, params):
    layer_in = jnp.transpose(x, (1, 0, 2)).astype(jnp.float32)
    for lp in params["lstm"]:
        fwd = _ref_lstm_dir(layer_in, lp["fwd"]["w_ih_t"], lp["fwd"]["w_hh_t"],
                            lp["fwd"]["b"])
        bwd = _ref_lstm_dir(layer_in[::-1], lp["bwd"]["w_ih_t"],
                            lp["bwd"]["w_hh_t"], lp["bwd"]["b"])[::-1]
        layer_in = jnp.concatenate([fwd, bwd], axis=-1)
    last = layer_in[-1]
    return last @ params["fc_w_t"] + params["fc_b"]


# ------------------------------------ Main ------------------------------------

if __name__ == "__main__":
    input_size, hidden_size, num_layers, num_classes = 16, 32, 2, 7
    batch, seq = 2, 8

    key = jax.random.PRNGKey(0)
    key, xkey, pkey = jax.random.split(key, 3)
    x = jax.random.normal(xkey, (batch, seq, input_size), dtype=jnp.float32)
    params = init_params(pkey, input_size, hidden_size, num_layers, num_classes)

    logits = emotion_lstm_classifier(x, params)
    logits = jax.block_until_ready(logits)

    ref = jax.block_until_ready(_ref_forward(x, params))
    assert logits.shape == (batch, num_classes)
    assert jnp.allclose(logits, ref, atol=2e-4, rtol=1e-4), (
        f"mismatch: max abs err {jnp.max(jnp.abs(logits - ref))}")

    print("KERNEL_OK")
</pallas_src>

<mosaic_0001>
module attributes {stable_mosaic.version = 11 : i64} {
  func.func @_fused_lstm_fc_kernel(%arg0: i32, %arg1: memref<248x256xf32, #tpu.memory_space<vmem>>, %arg2: memref<2x7xf32, #tpu.memory_space<vmem>>, %arg3: memref<16x256xf32, #tpu.memory_space<vmem>>, %arg4: memref<16x64xf32, #tpu.memory_space<vmem>>) attributes {dimension_semantics = [#tpu.dimension_semantics<arbitrary>], iteration_bounds = array<i64: 1>, scalar_prefetch = 0 : i64, scratch_operands = 2 : i64, tpu.core_type = #tpu.core_type<tc>, window_params = [{pipeline_mode = #tpu.pipeline_mode<synchronous>, transform_indices = @transform_0, window_bounds = array<i64: 248, 256>}, {pipeline_mode = #tpu.pipeline_mode<synchronous>, transform_indices = @transform_1, window_bounds = array<i64: 2, 7>}]} {
    %0 = tpu.iota {dimensions = array<i32: 0>} : vector<4x128xi32>
    %c2_i32 = arith.constant 2 : i32
    %1 = vector.broadcast %c2_i32 : i32 to vector<4x128xi32>
    %2 = arith.cmpi slt, %0, %1 : vector<4x128xi32>
    %cst = arith.constant 0.000000e+00 : f32
    %3 = vector.broadcast %cst : f32 to vector<4x32xf32>
    %c0 = arith.constant 0 : index
    %c0_0 = arith.constant 0 : index
    %4 = vector.load %arg1[%c0, %c0_0] : memref<248x256xf32, #tpu.memory_space<vmem>>, vector<16x16xf32>
    %c16 = arith.constant 16 : index
    %c0_1 = arith.constant 0 : index
    %5 = vector.load %arg1[%c16, %c0_1] : memref<248x256xf32, #tpu.memory_space<vmem>>, vector<16x256xf32>
    %c64 = arith.constant 64 : index
    %c0_2 = arith.constant 0 : index
    %6 = vector.load %arg1[%c64, %c0_2] : memref<248x256xf32, #tpu.memory_space<vmem>>, vector<1x256xf32>
    %cst_3 = arith.constant dense<0.000000e+00> : vector<16x256xf32>
    %7 = tpu.matmul %4, %5, %cst_3 {dimension_numbers = #tpu.dot_dimension_numbers<[1], [0], [0], [1], [0, 0, 1, 1], [], []>} : vector<16x16xf32>, vector<16x256xf32>, vector<16x256xf32> -> vector<16x256xf32>
    %8 = vector.broadcast %6 : vector<1x256xf32> to vector<16x256xf32>
    %9 = arith.addf %7, %8 : vector<16x256xf32>
    %c0_4 = arith.constant 0 : index
    %c0_5 = arith.constant 0 : index
    %10 = vector.load %arg3[%c0_4, %c0_5] : memref<16x256xf32, #tpu.memory_space<vmem>>, vector<16x256xf32>
    tpu.vector_store %arg3[%c0_4, %c0_5], %9 {strides = array<i32>} : memref<16x256xf32, #tpu.memory_space<vmem>>, vector<16x256xf32>,
    %c32 = arith.constant 32 : index
    %c0_6 = arith.constant 0 : index
    %11 = vector.load %arg1[%c32, %c0_6] : memref<248x256xf32, #tpu.memory_space<vmem>>, vector<32x256xf32>
    %cst_7 = arith.constant dense<0.000000e+00> : vector<4x256xf32>
    %12 = tpu.matmul %3, %11, %cst_7 {dimension_numbers = #tpu.dot_dimension_numbers<[1], [0], [0], [1], [0, 0, 1, 1], [], []>} : vector<4x32xf32>, vector<32x256xf32>, vector<4x256xf32> -> vector<4x256xf32>
    %13 = vector.extract_strided_slice %12 {offsets = [0, 0], sizes = [4, 128], strides = [1, 1]} : vector<4x256xf32> to vector<4x128xf32>
    %14 = vector.extract_strided_slice %12 {offsets = [0, 128], sizes = [4, 128], strides = [1, 1]} : vector<4x256xf32> to vector<4x128xf32>
    %15 = arith.select %2, %13, %14 : vector<4x128xi1>, vector<4x128xf32>
    %c0_8 = arith.constant 0 : index
    %c0_9 = arith.constant 0 : index
    %16 = vector.load %arg3[%c0_8, %c0_9] : memref<16x256xf32, #tpu.memory_space<vmem>>, vector<2x128xf32>
    %c14 = arith.constant 14 : index
    %c128 = arith.constant 128 : index
    %17 = vector.load %arg3[%c14, %c128] : memref<16x256xf32, #tpu.memory_space<vmem>>, vector<2x128xf32>
    %18 = tpu.concatenate %16, %17 in 0 : vector<2x128xf32>, vector<2x128xf32> -> vector<4x128xf32>
    %19 = arith.addf %15, %18 : vector<4x128xf32>
    %20 = vector.extract_strided_slice %19 {offsets = [0, 0], sizes = [4, 32], strides = [1, 1]} : vector<4x128xf32> to vector<4x32xf32>
    %21 = arith.negf %20 : vector<4x32xf32>
    %22 = math.exp %21 : vector<4x32xf32>
    %cst_10 = arith.constant 1.000000e+00 : f32
    %23 = vector.broadcast %cst_10 : f32 to vector<4x32xf32>
    %24 = arith.addf %23, %22 : vector<4x32xf32>
    %25 = arith.divf %23, %24 : vector<4x32xf32>
    %26 = vector.extract_strided_slice %19 {offsets = [0, 32], sizes = [4, 32], strides = [1, 1]} : vector<4x128xf32> to vector<4x32xf32>
    %27 = arith.negf %26 : vector<4x32xf32>
    %28 = math.exp %27 : vector<4x32xf32>
    %cst_11 = arith.constant 1.000000e+00 : f32
    %29 = vector.broadcast %cst_11 : f32 to vector<4x32xf32>
    %30 = arith.addf %29, %28 : vector<4x32xf32>
    %31 = arith.divf %29, %30 : vector<4x32xf32>
    %32 = vector.extract_strided_slice %19 {offsets = [0, 64], sizes = [4, 32], strides = [1, 1]} : vector<4x128xf32> to vector<4x32xf32>
    %33 = math.tanh %32 : vector<4x32xf32>
    %34 = vector.extract_strided_slice %19 {offsets = [0, 96], sizes = [4, 32], strides = [1, 1]} : vector<4x128xf32> to vector<4x32xf32>
    %35 = arith.negf %34 : vector<4x32xf32>
    %36 = math.exp %35 : vector<4x32xf32>
    %cst_12 = arith.constant 1.000000e+00 : f32
    %37 = vector.broadcast %cst_12 : f32 to vector<4x32xf32>
    %38 = arith.addf %37, %36 : vector<4x32xf32>
    %39 = arith.divf %37, %38 : vector<4x32xf32>
    %40 = arith.mulf %31, %3 : vector<4x32xf32>
    %41 = arith.mulf %25, %33 : vector<4x32xf32>
    %42 = arith.addf %40, %41 : vector<4x32xf32>
    %43 = math.tanh %42 : vector<4x32xf32>
    %44 = arith.mulf %39, %43 : vector<4x32xf32>
    %45 = vector.extract_strided_slice %44 {offsets = [0, 0], sizes = [2, 32], strides = [1, 1]} : vector<4x32xf32> to vector<2x32xf32>
    %c0_13 = arith.constant 0 : index
    %c0_14 = arith.constant 0 : index
    %46 = vector.load %arg4[%c0_13, %c0_14] : memref<16x64xf32, #tpu.memory_space<vmem>>, vector<2x32xf32>
    tpu.vector_store %arg4[%c0_13, %c0_14], %45 {strides = array<i32>} : memref<16x64xf32, #tpu.memory_space<vmem>>, vector<2x32xf32>,
    %47 = vector.extract_strided_slice %44 {offsets = [2, 0], sizes = [2, 32], strides = [1, 1]} : vector<4x32xf32> to vector<2x32xf32>
    %c14_15 = arith.constant 14 : index
    %c32_16 = arith.constant 32 : index
    %48 = vector.load %arg4[%c14_15, %c32_16] : memref<16x64xf32, #tpu.memory_space<vmem>>, vector<2x32xf32>
    tpu.vector_store %arg4[%c14_15, %c32_16], %47 {strides = array<i32>} : memref<16x64xf32, #tpu.memory_space<vmem>>, vector<2x32xf32>,
    %cst_17 = arith.constant dense<0.000000e+00> : vector<4x256xf32>
    %49 = tpu.matmul %44, %11, %cst_17 {dimension_numbers = #tpu.dot_dimension_numbers<[1], [0], [0], [1], [0, 0, 1, 1], [], []>} : vector<4x32xf32>, vector<32x256xf32>, vector<4x256xf32> -> vector<4x256xf32>
    %50 = vector.extract_strided_slice %49 {offsets = [0, 0], sizes = [4, 128], strides = [1, 1]} : vector<4x256xf32> to vector<4x128xf32>
    %51 = vector.extract_strided_slice %49 {offsets = [0, 128], sizes = [4, 128], strides = [1, 1]} : vector<4x256xf32> to vector<4x128xf32>
    %52 = arith.select %2, %50, %51 : vector<4x128xi1>, vector<4x128xf32>
    %c2 = arith.constant 2 : index
    %c0_18 = arith.constant 0 : index
    %53 = vector.load %arg3[%c2, %c0_18] : memref<16x256xf32, #tpu.memory_space<vmem>>, vector<2x128xf32>
    %c12 = arith.constant 12 : index
    %c128_19 = arith.constant 128 : index
    %54 = vector.load %arg3[%c12, %c128_19] : memref<16x256xf32, #tpu.memory_space<vmem>>, vector<2x128xf32>
    %55 = tpu.concatenate %53, %54 in 0 : vector<2x128xf32>, vector<2x128xf32> -> vector<4x128xf32>
    %56 = arith.addf %52, %55 : vector<4x128xf32>
    %57 = vector.extract_strided_slice %56 {offsets = [0, 0], sizes = [4, 32], strides = [1, 1]} : vector<4x128xf32> to vector<4x32xf32>
    %58 = arith.negf %57 : vector<4x32xf32>
    %59 = math.exp %58 : vector<4x32xf32>
    %cst_20 = arith.constant 1.000000e+00 : f32
    %60 = vector.broadcast %cst_20 : f32 to vector<4x32xf32>
    %61 = arith.addf %60, %59 : vector<4x32xf32>
    %62 = arith.divf %60, %61 : vector<4x32xf32>
    %63 = vector.extract_strided_slice %56 {offsets = [0, 32], sizes = [4, 32], strides = [1, 1]} : vector<4x128xf32> to vector<4x32xf32>
    %64 = arith.negf %63 : vector<4x32xf32>
    %65 = math.exp %64 : vector<4x32xf32>
    %cst_21 = arith.constant 1.000000e+00 : f32
    %66 = vector.broadcast %cst_21 : f32 to vector<4x32xf32>
    %67 = arith.addf %66, %65 : vector<4x32xf32>
    %68 = arith.divf %66, %67 : vector<4x32xf32>
    %69 = vector.extract_strided_slice %56 {offsets = [0, 64], sizes = [4, 32], strides = [1, 1]} : vector<4x128xf32> to vector<4x32xf32>
    %70 = math.tanh %69 : vector<4x32xf32>
    %71 = vector.extract_strided_slice %56 {offsets = [0, 96], sizes = [4, 32], strides = [1, 1]} : vector<4x128xf32> to vector<4x32xf32>
    %72 = arith.negf %71 : vector<4x32xf32>
    %73 = math.exp %72 : vector<4x32xf32>
    %cst_22 = arith.constant 1.000000e+00 : f32
    %74 = vector.broadcast %cst_22 : f32 to vector<4x32xf32>
    %75 = arith.addf %74, %73 : vector<4x32xf32>
    %76 = arith.divf %74, %75 : vector<4x32xf32>
    %77 = arith.mulf %68, %42 : vector<4x32xf32>
    %78 = arith.mulf %62, %70 : vector<4x32xf32>
    %79 = arith.addf %77, %78 : vector<4x32xf32>
    %80 = math.tanh %79 : vector<4x32xf32>
    %81 = arith.mulf %76, %80 : vector<4x32xf32>
    %82 = vector.extract_strided_slice %81 {offsets = [0, 0], sizes = [2, 32], strides = [1, 1]} : vector<4x32xf32> to vector<2x32xf32>
    %c2_23 = arith.constant 2 : index
    %c0_24 = arith.constant 0 : index
    %83 = vector.load %arg4[%c2_23, %c0_24] : memref<16x64xf32, #tpu.memory_space<vmem>>, vector<2x32xf32>
    tpu.vector_store %arg4[%c2_23, %c0_24], %82 {strides = array<i32>} : memref<16x64xf32, #tpu.memory_space<vmem>>, vector<2x32xf32>,
    %84 = vector.extract_strided_slice %81 {offsets = [2, 0], sizes = [2, 32], strides = [1, 1]} : vector<4x32xf32> to vector<2x32xf32>
    %c12_25 = arith.constant 12 : index
    %c32_26 = arith.constant 32 : index
    %85 = vector.load %arg4[%c12_25, %c32_26] : memref<16x64xf32, #tpu.memory_space<vmem>>, vector<2x32xf32>
    tpu.vector_store %arg4[%c12_25, %c32_26], %84 {strides = array<i32>} : memref<16x64xf32, #tpu.memory_space<vmem>>, vector<2x32xf32>,
    %cst_27 = arith.constant dense<0.000000e+00> : vector<4x256xf32>
    %86 = tpu.matmul %81, %11, %cst_27 {dimension_numbers = #tpu.dot_dimension_numbers<[1], [0], [0], [1], [0, 0, 1, 1], [], []>} : vector<4x32xf32>, vector<32x256xf32>, vector<4x256xf32> -> vector<4x256xf32>
    %87 = vector.extract_strided_slice %86 {offsets = [0, 0], sizes = [4, 128], strides = [1, 1]} : vector<4x256xf32> to vector<4x128xf32>
    %88 = vector.extract_strided_slice %86 {offsets = [0, 128], sizes = [4, 128], strides = [1, 1]} : vector<4x256xf32> to vector<4x128xf32>
    %89 = arith.select %2, %87, %88 : vector<4x128xi1>, vector<4x128xf32>
    %c4 = arith.constant 4 : index
    %c0_28 = arith.constant 0 : index
    %90 = vector.load %arg3[%c4, %c0_28] : memref<16x256xf32, #tpu.memory_space<vmem>>, vector<2x128xf32>
    %c10 = arith.constant 10 : index
    %c128_29 = arith.constant 128 : index
    %91 = vector.load %arg3[%c10, %c128_29] : memref<16x256xf32, #tpu.memory_space<vmem>>, vector<2x128xf32>
    %92 = tpu.concatenate %90, %91 in 0 : vector<2x128xf32>, vector<2x128xf32> -> vector<4x128xf32>
    %93 = arith.addf %89, %92 : vector<4x128xf32>
    %94 = vector.extract_strided_slice %93 {offsets = [0, 0], sizes = [4, 32], strides = [1, 1]} : vector<4x128xf32> to vector<4x32xf32>
    %95 = arith.negf %94 : vector<4x32xf32>
    %96 = math.exp %95 : vector<4x32xf32>
    %cst_30 = arith.constant 1.000000e+00 : f32
    %97 = vector.broadcast %cst_30 : f32 to vector<4x32xf32>
    %98 = arith.addf %97, %96 : vector<4x32xf32>
    %99 = arith.divf %97, %98 : vector<4x32xf32>
    %100 = vector.extract_strided_slice %93 {offsets = [0, 32], sizes = [4, 32], strides = [1, 1]} : vector<4x128xf32> to vector<4x32xf32>
    %101 = arith.negf %100 : vector<4x32xf32>
    %102 = math.exp %101 : vector<4x32xf32>
    %cst_31 = arith.constant 1.000000e+00 : f32
    %103 = vector.broadcast %cst_31 : f32 to vector<4x32xf32>
    %104 = arith.addf %103, %102 : vector<4x32xf32>
    %105 = arith.divf %103, %104 : vector<4x32xf32>
    %106 = vector.extract_strided_slice %93 {offsets = [0, 64], sizes = [4, 32], strides = [1, 1]} : vector<4x128xf32> to vector<4x32xf32>
    %107 = math.tanh %106 : vector<4x32xf32>
    %108 = vector.extract_strided_slice %93 {offsets = [0, 96], sizes = [4, 32], strides = [1, 1]} : vector<4x128xf32> to vector<4x32xf32>
    %109 = arith.negf %108 : vector<4x32xf32>
    %110 = math.exp %109 : vector<4x32xf32>
    %cst_32 = arith.constant 1.000000e+00 : f32
    %111 = vector.broadcast %cst_32 : f32 to vector<4x32xf32>
    %112 = arith.addf %111, %110 : vector<4x32xf32>
    %113 = arith.divf %111, %112 : vector<4x32xf32>
    %114 = arith.mulf %105, %79 : vector<4x32xf32>
    %115 = arith.mulf %99, %107 : vector<4x32xf32>
    %116 = arith.addf %114, %115 : vector<4x32xf32>
    %117 = math.tanh %116 : vector<4x32xf32>
    %118 = arith.mulf %113, %117 : vector<4x32xf32>
    %119 = vector.extract_strided_slice %118 {offsets = [0, 0], sizes = [2, 32], strides = [1, 1]} : vector<4x32xf32> to vector<2x32xf32>
    %c4_33 = arith.constant 4 : index
    %c0_34 = arith.constant 0 : index
    %120 = vector.load %arg4[%c4_33, %c0_34] : memref<16x64xf32, #tpu.memory_space<vmem>>, vector<2x32xf32>
    tpu.vector_store %arg4[%c4_33, %c0_34], %119 {strides = array<i32>} : memref<16x64xf32, #tpu.memory_space<vmem>>, vector<2x32xf32>,
    %121 = vector.extract_strided_slice %118 {offsets = [2, 0], sizes = [2, 32], strides = [1, 1]} : vector<4x32xf32> to vector<2x32xf32>
    %c10_35 = arith.constant 10 : index
    %c32_36 = arith.constant 32 : index
    %122 = vector.load %arg4[%c10_35, %c32_36] : memref<16x64xf32, #tpu.memory_space<vmem>>, vector<2x32xf32>
    tpu.vector_store %arg4[%c10_35, %c32_36], %121 {strides = array<i32>} : memref<16x64xf32, #tpu.memory_space<vmem>>, vector<2x32xf32>,
    %cst_37 = arith.constant dense<0.000000e+00> : vector<4x256xf32>
    %123 = tpu.matmul %118, %11, %cst_37 {dimension_numbers = #tpu.dot_dimension_numbers<[1], [0], [0], [1], [0, 0, 1, 1], [], []>} : vector<4x32xf32>, vector<32x256xf32>, vector<4x256xf32> -> vector<4x256xf32>
    %124 = vector.extract_strided_slice %123 {offsets = [0, 0], sizes = [4, 128], strides = [1, 1]} : vector<4x256xf32> to vector<4x128xf32>
    %125 = vector.extract_strided_slice %123 {offsets = [0, 128], sizes = [4, 128], strides = [1, 1]} : vector<4x256xf32> to vector<4x128xf32>
    %126 = arith.select %2, %124, %125 : vector<4x128xi1>, vector<4x128xf32>
    %c6 = arith.constant 6 : index
    %c0_38 = arith.constant 0 : index
    %127 = vector.load %arg3[%c6, %c0_38] : memref<16x256xf32, #tpu.memory_space<vmem>>, vector<2x128xf32>
    %c8 = arith.constant 8 : index
    %c128_39 = arith.constant 128 : index
    %128 = vector.load %arg3[%c8, %c128_39] : memref<16x256xf32, #tpu.memory_space<vmem>>, vector<2x128xf32>
    %129 = tpu.concatenate %127, %128 in 0 : vector<2x128xf32>, vector<2x128xf32> -> vector<4x128xf32>
    %130 = arith.addf %126, %129 : vector<4x128xf32>
    %131 = vector.extract_strided_slice %130 {offsets = [0, 0], sizes = [4, 32], strides = [1, 1]} : vector<4x128xf32> to vector<4x32xf32>
    %132 = arith.negf %131 : vector<4x32xf32>
    %133 = math.exp %132 : vector<4x32xf32>
    %cst_40 = arith.constant 1.000000e+00 : f32
    %134 = vector.broadcast %cst_40 : f32 to vector<4x32xf32>
    %135 = arith.addf %134, %133 : vector<4x32xf32>
    %136 = arith.divf %134, %135 : vector<4x32xf32>
    %137 = vector.extract_strided_slice %130 {offsets = [0, 32], sizes = [4, 32], strides = [1, 1]} : vector<4x128xf32> to vector<4x32xf32>
    %138 = arith.negf %137 : vector<4x32xf32>
    %139 = math.exp %138 : vector<4x32xf32>
    %cst_41 = arith.constant 1.000000e+00 : f32
    %140 = vector.broadcast %cst_41 : f32 to vector<4x32xf32>
    %141 = arith.addf %140, %139 : vector<4x32xf32>
    %142 = arith.divf %140, %141 : vector<4x32xf32>
    %143 = vector.extract_strided_slice %130 {offsets = [0, 64], sizes = [4, 32], strides = [1, 1]} : vector<4x128xf32> to vector<4x32xf32>
    %144 = math.tanh %143 : vector<4x32xf32>
    %145 = vector.extract_strided_slice %130 {offsets = [0, 96], sizes = [4, 32], strides = [1, 1]} : vector<4x128xf32> to vector<4x32xf32>
    %146 = arith.negf %145 : vector<4x32xf32>
    %147 = math.exp %146 : vector<4x32xf32>
    %cst_42 = arith.constant 1.000000e+00 : f32
    %148 = vector.broadcast %cst_42 : f32 to vector<4x32xf32>
    %149 = arith.addf %148, %147 : vector<4x32xf32>
    %150 = arith.divf %148, %149 : vector<4x32xf32>
    %151 = arith.mulf %142, %116 : vector<4x32xf32>
    %152 = arith.mulf %136, %144 : vector<4x32xf32>
    %153 = arith.addf %151, %152 : vector<4x32xf32>
    %154 = math.tanh %153 : vector<4x32xf32>
    %155 = arith.mulf %150, %154 : vector<4x32xf32>
    %156 = vector.extract_strided_slice %155 {offsets = [0, 0], sizes = [2, 32], strides = [1, 1]} : vector<4x32xf32> to vector<2x32xf32>
    %c6_43 = arith.constant 6 : index
    %c0_44 = arith.constant 0 : index
    %157 = vector.load %arg4[%c6_43, %c0_44] : memref<16x64xf32, #tpu.memory_space<vmem>>, vector<2x32xf32>
    tpu.vector_store %arg4[%c6_43, %c0_44], %156 {strides = array<i32>} : memref<16x64xf32, #tpu.memory_space<vmem>>, vector<2x32xf32>,
    %158 = vector.extract_strided_slice %155 {offsets = [2, 0], sizes = [2, 32], strides = [1, 1]} : vector<4x32xf32> to vector<2x32xf32>
    %c8_45 = arith.constant 8 : index
    %c32_46 = arith.constant 32 : index
    %159 = vector.load %arg4[%c8_45, %c32_46] : memref<16x64xf32, #tpu.memory_space<vmem>>, vector<2x32xf32>
    tpu.vector_store %arg4[%c8_45, %c32_46], %158 {strides = array<i32>} : memref<16x64xf32, #tpu.memory_space<vmem>>, vector<2x32xf32>,
    %cst_47 = arith.constant dense<0.000000e+00> : vector<4x256xf32>
    %160 = tpu.matmul %155, %11, %cst_47 {dimension_numbers = #tpu.dot_dimension_numbers<[1], [0], [0], [1], [0, 0, 1, 1], [], []>} : vector<4x32xf32>, vector<32x256xf32>, vector<4x256xf32> -> vector<4x256xf32>
    %161 = vector.extract_strided_slice %160 {offsets = [0, 0], sizes = [4, 128], strides = [1, 1]} : vector<4x256xf32> to vector<4x128xf32>
    %162 = vector.extract_strided_slice %160 {offsets = [0, 128], sizes = [4, 128], strides = [1, 1]} : vector<4x256xf32> to vector<4x128xf32>
    %163 = arith.select %2, %161, %162 : vector<4x128xi1>, vector<4x128xf32>
    %c8_48 = arith.constant 8 : index
    %c0_49 = arith.constant 0 : index
    %164 = vector.load %arg3[%c8_48, %c0_49] : memref<16x256xf32, #tpu.memory_space<vmem>>, vector<2x128xf32>
    %c6_50 = arith.constant 6 : index
    %c128_51 = arith.constant 128 : index
    %165 = vector.load %arg3[%c6_50, %c128_51] : memref<16x256xf32, #tpu.memory_space<vmem>>, vector<2x128xf32>
    %166 = tpu.concatenate %164, %165 in 0 : vector<2x128xf32>, vector<2x128xf32> -> vector<4x128xf32>
    %167 = arith.addf %163, %166 : vector<4x128xf32>
    %168 = vector.extract_strided_slice %167 {offsets = [0, 0], sizes = [4, 32], strides = [1, 1]} : vector<4x128xf32> to vector<4x32xf32>
    %169 = arith.negf %168 : vector<4x32xf32>
    %170 = math.exp %169 : vector<4x32xf32>
    %cst_52 = arith.constant 1.000000e+00 : f32
    %171 = vector.broadcast %cst_52 : f32 to vector<4x32xf32>
    %172 = arith.addf %171, %170 : vector<4x32xf32>
    %173 = arith.divf %171, %172 : vector<4x32xf32>
    %174 = vector.extract_strided_slice %167 {offsets = [0, 32], sizes = [4, 32], strides = [1, 1]} : vector<4x128xf32> to vector<4x32xf32>
    %175 = arith.negf %174 : vector<4x32xf32>
    %176 = math.exp %175 : vector<4x32xf32>
    %cst_53 = arith.constant 1.000000e+00 : f32
    %177 = vector.broadcast %cst_53 : f32 to vector<4x32xf32>
    %178 = arith.addf %177, %176 : vector<4x32xf32>
    %179 = arith.divf %177, %178 : vector<4x32xf32>
    %180 = vector.extract_strided_slice %167 {offsets = [0, 64], sizes = [4, 32], strides = [1, 1]} : vector<4x128xf32> to vector<4x32xf32>
    %181 = math.tanh %180 : vector<4x32xf32>
    %182 = vector.extract_strided_slice %167 {offsets = [0, 96], sizes = [4, 32], strides = [1, 1]} : vector<4x128xf32> to vector<4x32xf32>
    %183 = arith.negf %182 : vector<4x32xf32>
    %184 = math.exp %183 : vector<4x32xf32>
    %cst_54 = arith.constant 1.000000e+00 : f32
    %185 = vector.broadcast %cst_54 : f32 to vector<4x32xf32>
    %186 = arith.addf %185, %184 : vector<4x32xf32>
    %187 = arith.divf %185, %186 : vector<4x32xf32>
    %188 = arith.mulf %179, %153 : vector<4x32xf32>
    %189 = arith.mulf %173, %181 : vector<4x32xf32>
    %190 = arith.addf %188, %189 : vector<4x32xf32>
    %191 = math.tanh %190 : vector<4x32xf32>
    %192 = arith.mulf %187, %191 : vector<4x32xf32>
    %193 = vector.extract_strided_slice %192 {offsets = [0, 0], sizes = [2, 32], strides = [1, 1]} : vector<4x32xf32> to vector<2x32xf32>
    %c8_55 = arith.constant 8 : index
    %c0_56 = arith.constant 0 : index
    %194 = vector.load %arg4[%c8_55, %c0_56] : memref<16x64xf32, #tpu.memory_space<vmem>>, vector<2x32xf32>
    tpu.vector_store %arg4[%c8_55, %c0_56], %193 {strides = array<i32>} : memref<16x64xf32, #tpu.memory_space<vmem>>, vector<2x32xf32>,
    %195 = vector.extract_strided_slice %192 {offsets = [2, 0], sizes = [2, 32], strides = [1, 1]} : vector<4x32xf32> to vector<2x32xf32>
    %c6_57 = arith.constant 6 : index
    %c32_58 = arith.constant 32 : index
    %196 = vector.load %arg4[%c6_57, %c32_58] : memref<16x64xf32, #tpu.memory_space<vmem>>, vector<2x32xf32>
    tpu.vector_store %arg4[%c6_57, %c32_58], %195 {strides = array<i32>} : memref<16x64xf32, #tpu.memory_space<vmem>>, vector<2x32xf32>,
    %cst_59 = arith.constant dense<0.000000e+00> : vector<4x256xf32>
    %197 = tpu.matmul %192, %11, %cst_59 {dimension_numbers = #tpu.dot_dimension_numbers<[1], [0], [0], [1], [0, 0, 1, 1], [], []>} : vector<4x32xf32>, vector<32x256xf32>, vector<4x256xf32> -> vector<4x256xf32>
    %198 = vector.extract_strided_slice %197 {offsets = [0, 0], sizes = [4, 128], strides = [1, 1]} : vector<4x256xf32> to vector<4x128xf32>
    %199 = vector.extract_strided_slice %197 {offsets = [0, 128], sizes = [4, 128], strides = [1, 1]} : vector<4x256xf32> to vector<4x128xf32>
    %200 = arith.select %2, %198, %199 : vector<4x128xi1>, vector<4x128xf32>
    %c10_60 = arith.constant 10 : index
    %c0_61 = arith.constant 0 : index
    %201 = vector.load %arg3[%c10_60, %c0_61] : memref<16x256xf32, #tpu.memory_space<vmem>>, vector<2x128xf32>
    %c4_62 = arith.constant 4 : index
    %c128_63 = arith.constant 128 : index
    %202 = vector.load %arg3[%c4_62, %c128_63] : memref<16x256xf32, #tpu.memory_space<vmem>>, vector<2x128xf32>
    %203 = tpu.concatenate %201, %202 in 0 : vector<2x128xf32>, vector<2x128xf32> -> vector<4x128xf32>
    %204 = arith.addf %200, %203 : vector<4x128xf32>
    %205 = vector.extract_strided_slice %204 {offsets = [0, 0], sizes = [4, 32], strides = [1, 1]} : vector<4x128xf32> to vector<4x32xf32>
    %206 = arith.negf %205 : vector<4x32xf32>
    %207 = math.exp %206 : vector<4x32xf32>
    %cst_64 = arith.constant 1.000000e+00 : f32
    %208 = vector.broadcast %cst_64 : f32 to vector<4x32xf32>
    %209 = arith.addf %208, %207 : vector<4x32xf32>
    %210 = arith.divf %208, %209 : vector<4x32xf32>
    %211 = vector.extract_strided_slice %204 {offsets = [0, 32], sizes = [4, 32], strides = [1, 1]} : vector<4x128xf32> to vector<4x32xf32>
    %212 = arith.negf %211 : vector<4x32xf32>
    %213 = math.exp %212 : vector<4x32xf32>
    %cst_65 = arith.constant 1.000000e+00 : f32
    %214 = vector.broadcast %cst_65 : f32 to vector<4x32xf32>
    %215 = arith.addf %214, %213 : vector<4x32xf32>
    %216 = arith.divf %214, %215 : vector<4x32xf32>
    %217 = vector.extract_strided_slice %204 {offsets = [0, 64], sizes = [4, 32], strides = [1, 1]} : vector<4x128xf32> to vector<4x32xf32>
    %218 = math.tanh %217 : vector<4x32xf32>
    %219 = vector.extract_strided_slice %204 {offsets = [0, 96], sizes = [4, 32], strides = [1, 1]} : vector<4x128xf32> to vector<4x32xf32>
    %220 = arith.negf %219 : vector<4x32xf32>
    %221 = math.exp %220 : vector<4x32xf32>
    %cst_66 = arith.constant 1.000000e+00 : f32
    %222 = vector.broadcast %cst_66 : f32 to vector<4x32xf32>
    %223 = arith.addf %222, %221 : vector<4x32xf32>
    %224 = arith.divf %222, %223 : vector<4x32xf32>
    %225 = arith.mulf %216, %190 : vector<4x32xf32>
    %226 = arith.mulf %210, %218 : vector<4x32xf32>
    %227 = arith.addf %225, %226 : vector<4x32xf32>
    %228 = math.tanh %227 : vector<4x32xf32>
    %229 = arith.mulf %224, %228 : vector<4x32xf32>
    %230 = vector.extract_strided_slice %229 {offsets = [0, 0], sizes = [2, 32], strides = [1, 1]} : vector<4x32xf32> to vector<2x32xf32>
    %c10_67 = arith.constant 10 : index
    %c0_68 = arith.constant 0 : index
    %231 = vector.load %arg4[%c10_67, %c0_68] : memref<16x64xf32, #tpu.memory_space<vmem>>, vector<2x32xf32>
    tpu.vector_store %arg4[%c10_67, %c0_68], %230 {strides = array<i32>} : memref<16x64xf32, #tpu.memory_space<vmem>>, vector<2x32xf32>,
    %232 = vector.extract_strided_slice %229 {offsets = [2, 0], sizes = [2, 32], strides = [1, 1]} : vector<4x32xf32> to vector<2x32xf32>
    %c4_69 = arith.constant 4 : index
    %c32_70 = arith.constant 32 : index
    %233 = vector.load %arg4[%c4_69, %c32_70] : memref<16x64xf32, #tpu.memory_space<vmem>>, vector<2x32xf32>
    tpu.vector_store %arg4[%c4_69, %c32_70], %232 {strides = array<i32>} : memref<16x64xf32, #tpu.memory_space<vmem>>, vector<2x32xf32>,
    %cst_71 = arith.constant dense<0.000000e+00> : vector<4x256xf32>
    %234 = tpu.matmul %229, %11, %cst_71 {dimension_numbers = #tpu.dot_dimension_numbers<[1], [0], [0], [1], [0, 0, 1, 1], [], []>} : vector<4x32xf32>, vector<32x256xf32>, vector<4x256xf32> -> vector<4x256xf32>
    %235 = vector.extract_strided_slice %234 {offsets = [0, 0], sizes = [4, 128], strides = [1, 1]} : vector<4x256xf32> to vector<4x128xf32>
    %236 = vector.extract_strided_slice %234 {offsets = [0, 128], sizes = [4, 128], strides = [1, 1]} : vector<4x256xf32> to vector<4x128xf32>
    %237 = arith.select %2, %235, %236 : vector<4x128xi1>, vector<4x128xf32>
    %c12_72 = arith.constant 12 : index
    %c0_73 = arith.constant 0 : index
    %238 = vector.load %arg3[%c12_72, %c0_73] : memref<16x256xf32, #tpu.memory_space<vmem>>, vector<2x128xf32>
    %c2_74 = arith.constant 2 : index
    %c128_75 = arith.constant 128 : index
    %239 = vector.load %arg3[%c2_74, %c128_75] : memref<16x256xf32, #tpu.memory_space<vmem>>, vector<2x128xf32>
    %240 = tpu.concatenate %238, %239 in 0 : vector<2x128xf32>, vector<2x128xf32> -> vector<4x128xf32>
    %241 = arith.addf %237, %240 : vector<4x128xf32>
    %242 = vector.extract_strided_slice %241 {offsets = [0, 0], sizes = [4, 32], strides = [1, 1]} : vector<4x128xf32> to vector<4x32xf32>
    %243 = arith.negf %242 : vector<4x32xf32>
    %244 = math.exp %243 : vector<4x32xf32>
    %cst_76 = arith.constant 1.000000e+00 : f32
    %245 = vector.broadcast %cst_76 : f32 to vector<4x32xf32>
    %246 = arith.addf %245, %244 : vector<4x32xf32>
    %247 = arith.divf %245, %246 : vector<4x32xf32>
    %248 = vector.extract_strided_slice %241 {offsets = [0, 32], sizes = [4, 32], strides = [1, 1]} : vector<4x128xf32> to vector<4x32xf32>
    %249 = arith.negf %248 : vector<4x32xf32>
    %250 = math.exp %249 : vector<4x32xf32>
    %cst_77 = arith.constant 1.000000e+00 : f32
    %251 = vector.broadcast %cst_77 : f32 to vector<4x32xf32>
    %252 = arith.addf %251, %250 : vector<4x32xf32>
    %253 = arith.divf %251, %252 : vector<4x32xf32>
    %254 = vector.extract_strided_slice %241 {offsets = [0, 64], sizes = [4, 32], strides = [1, 1]} : vector<4x128xf32> to vector<4x32xf32>
    %255 = math.tanh %254 : vector<4x32xf32>
    %256 = vector.extract_strided_slice %241 {offsets = [0, 96], sizes = [4, 32], strides = [1, 1]} : vector<4x128xf32> to vector<4x32xf32>
    %257 = arith.negf %256 : vector<4x32xf32>
    %258 = math.exp %257 : vector<4x32xf32>
    %cst_78 = arith.constant 1.000000e+00 : f32
    %259 = vector.broadcast %cst_78 : f32 to vector<4x32xf32>
    %260 = arith.addf %259, %258 : vector<4x32xf32>
    %261 = arith.divf %259, %260 : vector<4x32xf32>
    %262 = arith.mulf %253, %227 : vector<4x32xf32>
    %263 = arith.mulf %247, %255 : vector<4x32xf32>
    %264 = arith.addf %262, %263 : vector<4x32xf32>
    %265 = math.tanh %264 : vector<4x32xf32>
    %266 = arith.mulf %261, %265 : vector<4x32xf32>
    %267 = vector.extract_strided_slice %266 {offsets = [0, 0], sizes = [2, 32], strides = [1, 1]} : vector<4x32xf32> to vector<2x32xf32>
    %c12_79 = arith.constant 12 : index
    %c0_80 = arith.constant 0 : index
    %268 = vector.load %arg4[%c12_79, %c0_80] : memref<16x64xf32, #tpu.memory_space<vmem>>, vector<2x32xf32>
    tpu.vector_store %arg4[%c12_79, %c0_80], %267 {strides = array<i32>} : memref<16x64xf32, #tpu.memory_space<vmem>>, vector<2x32xf32>,
    %269 = vector.extract_strided_slice %266 {offsets = [2, 0], sizes = [2, 32], strides = [1, 1]} : vector<4x32xf32> to vector<2x32xf32>
    %c2_81 = arith.constant 2 : index
    %c32_82 = arith.constant 32 : index
    %270 = vector.load %arg4[%c2_81, %c32_82] : memref<16x64xf32, #tpu.memory_space<vmem>>, vector<2x32xf32>
    tpu.vector_store %arg4[%c2_81, %c32_82], %269 {strides = array<i32>} : memref<16x64xf32, #tpu.memory_space<vmem>>, vector<2x32xf32>,
    %cst_83 = arith.constant dense<0.000000e+00> : vector<4x256xf32>
    %271 = tpu.matmul %266, %11, %cst_83 {dimension_numbers = #tpu.dot_dimension_numbers<[1], [0], [0], [1], [0, 0, 1, 1], [], []>} : vector<4x32xf32>, vector<32x256xf32>, vector<4x256xf32> -> vector<4x256xf32>
    %272 = vector.extract_strided_slice %271 {offsets = [0, 0], sizes = [4, 128], strides = [1, 1]} : vector<4x256xf32> to vector<4x128xf32>
    %273 = vector.extract_strided_slice %271 {offsets = [0, 128], sizes = [4, 128], strides = [1, 1]} : vector<4x256xf32> to vector<4x128xf32>
    %274 = arith.select %2, %272, %273 : vector<4x128xi1>, vector<4x128xf32>
    %c14_84 = arith.constant 14 : index
    %c0_85 = arith.constant 0 : index
    %275 = vector.load %arg3[%c14_84, %c0_85] : memref<16x256xf32, #tpu.memory_space<vmem>>, vector<2x128xf32>
    %c0_86 = arith.constant 0 : index
    %c128_87 = arith.constant 128 : index
    %276 = vector.load %arg3[%c0_86, %c128_87] : memref<16x256xf32, #tpu.memory_space<vmem>>, vector<2x128xf32>
    %277 = tpu.concatenate %275, %276 in 0 : vector<2x128xf32>, vector<2x128xf32> -> vector<4x128xf32>
    %278 = arith.addf %274, %277 : vector<4x128xf32>
    %279 = vector.extract_strided_slice %278 {offsets = [0, 0], sizes = [4, 32], strides = [1, 1]} : vector<4x128xf32> to vector<4x32xf32>
    %280 = arith.negf %279 : vector<4x32xf32>
    %281 = math.exp %280 : vector<4x32xf32>
    %cst_88 = arith.constant 1.000000e+00 : f32
    %282 = vector.broadcast %cst_88 : f32 to vector<4x32xf32>
    %283 = arith.addf %282, %281 : vector<4x32xf32>
    %284 = arith.divf %282, %283 : vector<4x32xf32>
    %285 = vector.extract_strided_slice %278 {offsets = [0, 32], sizes = [4, 32], strides = [1, 1]} : vector<4x128xf32> to vector<4x32xf32>
    %286 = arith.negf %285 : vector<4x32xf32>
    %287 = math.exp %286 : vector<4x32xf32>
    %cst_89 = arith.constant 1.000000e+00 : f32
    %288 = vector.broadcast %cst_89 : f32 to vector<4x32xf32>
    %289 = arith.addf %288, %287 : vector<4x32xf32>
    %290 = arith.divf %288, %289 : vector<4x32xf32>
    %291 = vector.extract_strided_slice %278 {offsets = [0, 64], sizes = [4, 32], strides = [1, 1]} : vector<4x128xf32> to vector<4x32xf32>
    %292 = math.tanh %291 : vector<4x32xf32>
    %293 = vector.extract_strided_slice %278 {offsets = [0, 96], sizes = [4, 32], strides = [1, 1]} : vector<4x128xf32> to vector<4x32xf32>
    %294 = arith.negf %293 : vector<4x32xf32>
    %295 = math.exp %294 : vector<4x32xf32>
    %cst_90 = arith.constant 1.000000e+00 : f32
    %296 = vector.broadcast %cst_90 : f32 to vector<4x32xf32>
    %297 = arith.addf %296, %295 : vector<4x32xf32>
    %298 = arith.divf %296, %297 : vector<4x32xf32>
    %299 = arith.mulf %290, %264 : vector<4x32xf32>
    %300 = arith.mulf %284, %292 : vector<4x32xf32>
    %301 = arith.addf %299, %300 : vector<4x32xf32>
    %302 = math.tanh %301 : vector<4x32xf32>
    %303 = arith.mulf %298, %302 : vector<4x32xf32>
    %304 = vector.extract_strided_slice %303 {offsets = [0, 0], sizes = [2, 32], strides = [1, 1]} : vector<4x32xf32> to vector<2x32xf32>
    %c14_91 = arith.constant 14 : index
    %c0_92 = arith.constant 0 : index
    %305 = vector.load %arg4[%c14_91, %c0_92] : memref<16x64xf32, #tpu.memory_space<vmem>>, vector<2x32xf32>
    tpu.vector_store %arg4[%c14_91, %c0_92], %304 {strides = array<i32>} : memref<16x64xf32, #tpu.memory_space<vmem>>, vector<2x32xf32>,
    %306 = vector.extract_strided_slice %303 {offsets = [2, 0], sizes = [2, 32], strides = [1, 1]} : vector<4x32xf32> to vector<2x32xf32>
    %c0_93 = arith.constant 0 : index
    %c32_94 = arith.constant 32 : index
    %307 = vector.load %arg4[%c0_93, %c32_94] : memref<16x64xf32, #tpu.memory_space<vmem>>, vector<2x32xf32>
    tpu.vector_store %arg4[%c0_93, %c32_94], %306 {strides = array<i32>} : memref<16x64xf32, #tpu.memory_space<vmem>>, vector<2x32xf32>,
    %c0_95 = arith.constant 0 : index
    %c0_96 = arith.constant 0 : index
    %308 = vector.load %arg4[%c0_95, %c0_96] : memref<16x64xf32, #tpu.memory_space<vmem>>, vector<16x64xf32>
    %c72 = arith.constant 72 : index
    %c0_97 = arith.constant 0 : index
    %309 = vector.load %arg1[%c72, %c0_97] : memref<248x256xf32, #tpu.memory_space<vmem>>, vector<64x256xf32>
    %c168 = arith.constant 168 : index
    %c0_98 = arith.constant 0 : index
    %310 = vector.load %arg1[%c168, %c0_98] : memref<248x256xf32, #tpu.memory_space<vmem>>, vector<1x256xf32>
    %cst_99 = arith.constant dense<0.000000e+00> : vector<16x256xf32>
    %311 = tpu.matmul %308, %309, %cst_99 {dimension_numbers = #tpu.dot_dimension_numbers<[1], [0], [0], [1], [0, 0, 1, 1], [], []>} : vector<16x64xf32>, vector<64x256xf32>, vector<16x256xf32> -> vector<16x256xf32>
    %312 = vector.broadcast %310 : vector<1x256xf32> to vector<16x256xf32>
    %313 = arith.addf %311, %312 : vector<16x256xf32>
    %c0_100 = arith.constant 0 : index
    %c0_101 = arith.constant 0 : index
    %314 = vector.load %arg3[%c0_100, %c0_101] : memref<16x256xf32, #tpu.memory_space<vmem>>, vector<16x256xf32>
    tpu.vector_store %arg3[%c0_100, %c0_101], %313 {strides = array<i32>} : memref<16x256xf32, #tpu.memory_space<vmem>>, vector<16x256xf32>,
    %c136 = arith.constant 136 : index
    %c0_102 = arith.constant 0 : index
    %315 = vector.load %arg1[%c136, %c0_102] : memref<248x256xf32, #tpu.memory_space<vmem>>, vector<32x256xf32>
    %cst_103 = arith.constant dense<0.000000e+00> : vector<4x256xf32>
    %316 = tpu.matmul %3, %315, %cst_103 {dimension_numbers = #tpu.dot_dimension_numbers<[1], [0], [0], [1], [0, 0, 1, 1], [], []>} : vector<4x32xf32>, vector<32x256xf32>, vector<4x256xf32> -> vector<4x256xf32>
    %317 = vector.extract_strided_slice %316 {offsets = [0, 0], sizes = [4, 128], strides = [1, 1]} : vector<4x256xf32> to vector<4x128xf32>
    %318 = vector.extract_strided_slice %316 {offsets = [0, 128], sizes = [4, 128], strides = [1, 1]} : vector<4x256xf32> to vector<4x128xf32>
    %319 = arith.select %2, %317, %318 : vector<4x128xi1>, vector<4x128xf32>
    %c0_104 = arith.constant 0 : index
    %c0_105 = arith.constant 0 : index
    %320 = vector.load %arg3[%c0_104, %c0_105] : memref<16x256xf32, #tpu.memory_space<vmem>>, vector<2x128xf32>
    %c14_106 = arith.constant 14 : index
    %c128_107 = arith.constant 128 : index
    %321 = vector.load %arg3[%c14_106, %c128_107] : memref<16x256xf32, #tpu.memory_space<vmem>>, vector<2x128xf32>
    %322 = tpu.concatenate %320, %321 in 0 : vector<2x128xf32>, vector<2x128xf32> -> vector<4x128xf32>
    %323 = arith.addf %319, %322 : vector<4x128xf32>
    %324 = vector.extract_strided_slice %323 {offsets = [0, 0], sizes = [4, 32], strides = [1, 1]} : vector<4x128xf32> to vector<4x32xf32>
    %325 = arith.negf %324 : vector<4x32xf32>
    %326 = math.exp %325 : vector<4x32xf32>
    %cst_108 = arith.constant 1.000000e+00 : f32
    %327 = vector.broadcast %cst_108 : f32 to vector<4x32xf32>
    %328 = arith.addf %327, %326 : vector<4x32xf32>
    %329 = arith.divf %327, %328 : vector<4x32xf32>
    %330 = vector.extract_strided_slice %323 {offsets = [0, 32], sizes = [4, 32], strides = [1, 1]} : vector<4x128xf32> to vector<4x32xf32>
    %331 = arith.negf %330 : vector<4x32xf32>
    %332 = math.exp %331 : vector<4x32xf32>
    %cst_109 = arith.constant 1.000000e+00 : f32
    %333 = vector.broadcast %cst_109 : f32 to vector<4x32xf32>
    %334 = arith.addf %333, %332 : vector<4x32xf32>
    %335 = arith.divf %333, %334 : vector<4x32xf32>
    %336 = vector.extract_strided_slice %323 {offsets = [0, 64], sizes = [4, 32], strides = [1, 1]} : vector<4x128xf32> to vector<4x32xf32>
    %337 = math.tanh %336 : vector<4x32xf32>
    %338 = vector.extract_strided_slice %323 {offsets = [0, 96], sizes = [4, 32], strides = [1, 1]} : vector<4x128xf32> to vector<4x32xf32>
    %339 = arith.negf %338 : vector<4x32xf32>
    %340 = math.exp %339 : vector<4x32xf32>
    %cst_110 = arith.constant 1.000000e+00 : f32
    %341 = vector.broadcast %cst_110 : f32 to vector<4x32xf32>
    %342 = arith.addf %341, %340 : vector<4x32xf32>
    %343 = arith.divf %341, %342 : vector<4x32xf32>
    %344 = arith.mulf %335, %3 : vector<4x32xf32>
    %345 = arith.mulf %329, %337 : vector<4x32xf32>
    %346 = arith.addf %344, %345 : vector<4x32xf32>
    %347 = math.tanh %346 : vector<4x32xf32>
    %348 = arith.mulf %343, %347 : vector<4x32xf32>
    %349 = vector.extract_strided_slice %348 {offsets = [2, 0], sizes = [2, 32], strides = [1, 1]} : vector<4x32xf32> to vector<2x32xf32>
    %cst_111 = arith.constant dense<0.000000e+00> : vector<4x256xf32>
    %350 = tpu.matmul %348, %315, %cst_111 {dimension_numbers = #tpu.dot_dimension_numbers<[1], [0], [0], [1], [0, 0, 1, 1], [], []>} : vector<4x32xf32>, vector<32x256xf32>, vector<4x256xf32> -> vector<4x256xf32>
    %351 = vector.extract_strided_slice %350 {offsets = [0, 0], sizes = [4, 128], strides = [1, 1]} : vector<4x256xf32> to vector<4x128xf32>
    %352 = vector.extract_strided_slice %350 {offsets = [0, 128], sizes = [4, 128], strides = [1, 1]} : vector<4x256xf32> to vector<4x128xf32>
    %353 = arith.select %2, %351, %352 : vector<4x128xi1>, vector<4x128xf32>
    %c2_112 = arith.constant 2 : index
    %c0_113 = arith.constant 0 : index
    %354 = vector.load %arg3[%c2_112, %c0_113] : memref<16x256xf32, #tpu.memory_space<vmem>>, vector<2x128xf32>
    %c12_114 = arith.constant 12 : index
    %c128_115 = arith.constant 128 : index
    %355 = vector.load %arg3[%c12_114, %c128_115] : memref<16x256xf32, #tpu.memory_space<vmem>>, vector<2x128xf32>
    %356 = tpu.concatenate %354, %355 in 0 : vector<2x128xf32>, vector<2x128xf32> -> vector<4x128xf32>
    %357 = arith.addf %353, %356 : vector<4x128xf32>
    %358 = vector.extract_strided_slice %357 {offsets = [0, 0], sizes = [4, 32], strides = [1, 1]} : vector<4x128xf32> to vector<4x32xf32>
    %359 = arith.negf %358 : vector<4x32xf32>
    %360 = math.exp %359 : vector<4x32xf32>
    %cst_116 = arith.constant 1.000000e+00 : f32
    %361 = vector.broadcast %cst_116 : f32 to vector<4x32xf32>
    %362 = arith.addf %361, %360 : vector<4x32xf32>
    %363 = arith.divf %361, %362 : vector<4x32xf32>
    %364 = vector.extract_strided_slice %357 {offsets = [0, 32], sizes = [4, 32], strides = [1, 1]} : vector<4x128xf32> to vector<4x32xf32>
    %365 = arith.negf %364 : vector<4x32xf32>
    %366 = math.exp %365 : vector<4x32xf32>
    %cst_117 = arith.constant 1.000000e+00 : f32
    %367 = vector.broadcast %cst_117 : f32 to vector<4x32xf32>
    %368 = arith.addf %367, %366 : vector<4x32xf32>
    %369 = arith.divf %367, %368 : vector<4x32xf32>
    %370 = vector.extract_strided_slice %357 {offsets = [0, 64], sizes = [4, 32], strides = [1, 1]} : vector<4x128xf32> to vector<4x32xf32>
    %371 = math.tanh %370 : vector<4x32xf32>
    %372 = vector.extract_strided_slice %357 {offsets = [0, 96], sizes = [4, 32], strides = [1, 1]} : vector<4x128xf32> to vector<4x32xf32>
    %373 = arith.negf %372 : vector<4x32xf32>
    %374 = math.exp %373 : vector<4x32xf32>
    %cst_118 = arith.constant 1.000000e+00 : f32
    %375 = vector.broadcast %cst_118 : f32 to vector<4x32xf32>
    %376 = arith.addf %375, %374 : vector<4x32xf32>
    %377 = arith.divf %375, %376 : vector<4x32xf32>
    %378 = arith.mulf %369, %346 : vector<4x32xf32>
    %379 = arith.mulf %363, %371 : vector<4x32xf32>
    %380 = arith.addf %378, %379 : vector<4x32xf32>
    %381 = math.tanh %380 : vector<4x32xf32>
    %382 = arith.mulf %377, %381 : vector<4x32xf32>
    %cst_119 = arith.constant dense<0.000000e+00> : vector<4x256xf32>
    %383 = tpu.matmul %382, %315, %cst_119 {dimension_numbers = #tpu.dot_dimension_numbers<[1], [0], [0], [1], [0, 0, 1, 1], [], []>} : vector<4x32xf32>, vector<32x256xf32>, vector<4x256xf32> -> vector<4x256xf32>
    %384 = vector.extract_strided_slice %383 {offsets = [0, 0], sizes = [4, 128], strides = [1, 1]} : vector<4x256xf32> to vector<4x128xf32>
    %385 = vector.extract_strided_slice %383 {offsets = [0, 128], sizes = [4, 128], strides = [1, 1]} : vector<4x256xf32> to vector<4x128xf32>
    %386 = arith.select %2, %384, %385 : vector<4x128xi1>, vector<4x128xf32>
    %c4_120 = arith.constant 4 : index
    %c0_121 = arith.constant 0 : index
    %387 = vector.load %arg3[%c4_120, %c0_121] : memref<16x256xf32, #tpu.memory_space<vmem>>, vector<2x128xf32>
    %c10_122 = arith.constant 10 : index
    %c128_123 = arith.constant 128 : index
    %388 = vector.load %arg3[%c10_122, %c128_123] : memref<16x256xf32, #tpu.memory_space<vmem>>, vector<2x128xf32>
    %389 = tpu.concatenate %387, %388 in 0 : vector<2x128xf32>, vector<2x128xf32> -> vector<4x128xf32>
    %390 = arith.addf %386, %389 : vector<4x128xf32>
    %391 = vector.extract_strided_slice %390 {offsets = [0, 0], sizes = [4, 32], strides = [1, 1]} : vector<4x128xf32> to vector<4x32xf32>
    %392 = arith.negf %391 : vector<4x32xf32>
    %393 = math.exp %392 : vector<4x32xf32>
    %cst_124 = arith.constant 1.000000e+00 : f32
    %394 = vector.broadcast %cst_124 : f32 to vector<4x32xf32>
    %395 = arith.addf %394, %393 : vector<4x32xf32>
    %396 = arith.divf %394, %395 : vector<4x32xf32>
    %397 = vector.extract_strided_slice %390 {offsets = [0, 32], sizes = [4, 32], strides = [1, 1]} : vector<4x128xf32> to vector<4x32xf32>
    %398 = arith.negf %397 : vector<4x32xf32>
    %399 = math.exp %398 : vector<4x32xf32>
    %cst_125 = arith.constant 1.000000e+00 : f32
    %400 = vector.broadcast %cst_125 : f32 to vector<4x32xf32>
    %401 = arith.addf %400, %399 : vector<4x32xf32>
    %402 = arith.divf %400, %401 : vector<4x32xf32>
    %403 = vector.extract_strided_slice %390 {offsets = [0, 64], sizes = [4, 32], strides = [1, 1]} : vector<4x128xf32> to vector<4x32xf32>
    %404 = math.tanh %403 : vector<4x32xf32>
    %405 = vector.extract_strided_slice %390 {offsets = [0, 96], sizes = [4, 32], strides = [1, 1]} : vector<4x128xf32> to vector<4x32xf32>
    %406 = arith.negf %405 : vector<4x32xf32>
    %407 = math.exp %406 : vector<4x32xf32>
    %cst_126 = arith.constant 1.000000e+00 : f32
    %408 = vector.broadcast %cst_126 : f32 to vector<4x32xf32>
    %409 = arith.addf %408, %407 : vector<4x32xf32>
    %410 = arith.divf %408, %409 : vector<4x32xf32>
    %411 = arith.mulf %402, %380 : vector<4x32xf32>
    %412 = arith.mulf %396, %404 : vector<4x32xf32>
    %413 = arith.addf %411, %412 : vector<4x32xf32>
    %414 = math.tanh %413 : vector<4x32xf32>
    %415 = arith.mulf %410, %414 : vector<4x32xf32>
    %cst_127 = arith.constant dense<0.000000e+00> : vector<4x256xf32>
    %416 = tpu.matmul %415, %315, %cst_127 {dimension_numbers = #tpu.dot_dimension_numbers<[1], [0], [0], [1], [0, 0, 1, 1], [], []>} : vector<4x32xf32>, vector<32x256xf32>, vector<4x256xf32> -> vector<4x256xf32>
    %417 = vector.extract_strided_slice %416 {offsets = [0, 0], sizes = [4, 128], strides = [1, 1]} : vector<4x256xf32> to vector<4x128xf32>
    %418 = vector.extract_strided_slice %416 {offsets = [0, 128], sizes = [4, 128], strides = [1, 1]} : vector<4x256xf32> to vector<4x128xf32>
    %419 = arith.select %2, %417, %418 : vector<4x128xi1>, vector<4x128xf32>
    %c6_128 = arith.constant 6 : index
    %c0_129 = arith.constant 0 : index
    %420 = vector.load %arg3[%c6_128, %c0_129] : memref<16x256xf32, #tpu.memory_space<vmem>>, vector<2x128xf32>
    %c8_130 = arith.constant 8 : index
    %c128_131 = arith.constant 128 : index
    %421 = vector.load %arg3[%c8_130, %c128_131] : memref<16x256xf32, #tpu.memory_space<vmem>>, vector<2x128xf32>
    %422 = tpu.concatenate %420, %421 in 0 : vector<2x128xf32>, vector<2x128xf32> -> vector<4x128xf32>
    %423 = arith.addf %419, %422 : vector<4x128xf32>
    %424 = vector.extract_strided_slice %423 {offsets = [0, 0], sizes = [4, 32], strides = [1, 1]} : vector<4x128xf32> to vector<4x32xf32>
    %425 = arith.negf %424 : vector<4x32xf32>
    %426 = math.exp %425 : vector<4x32xf32>
    %cst_132 = arith.constant 1.000000e+00 : f32
    %427 = vector.broadcast %cst_132 : f32 to vector<4x32xf32>
    %428 = arith.addf %427, %426 : vector<4x32xf32>
    %429 = arith.divf %427, %428 : vector<4x32xf32>
    %430 = vector.extract_strided_slice %423 {offsets = [0, 32], sizes = [4, 32], strides = [1, 1]} : vector<4x128xf32> to vector<4x32xf32>
    %431 = arith.negf %430 : vector<4x32xf32>
    %432 = math.exp %431 : vector<4x32xf32>
    %cst_133 = arith.constant 1.000000e+00 : f32
    %433 = vector.broadcast %cst_133 : f32 to vector<4x32xf32>
    %434 = arith.addf %433, %432 : vector<4x32xf32>
    %435 = arith.divf %433, %434 : vector<4x32xf32>
    %436 = vector.extract_strided_slice %423 {offsets = [0, 64], sizes = [4, 32], strides = [1, 1]} : vector<4x128xf32> to vector<4x32xf32>
    %437 = math.tanh %436 : vector<4x32xf32>
    %438 = vector.extract_strided_slice %423 {offsets = [0, 96], sizes = [4, 32], strides = [1, 1]} : vector<4x128xf32> to vector<4x32xf32>
    %439 = arith.negf %438 : vector<4x32xf32>
    %440 = math.exp %439 : vector<4x32xf32>
    %cst_134 = arith.constant 1.000000e+00 : f32
    %441 = vector.broadcast %cst_134 : f32 to vector<4x32xf32>
    %442 = arith.addf %441, %440 : vector<4x32xf32>
    %443 = arith.divf %441, %442 : vector<4x32xf32>
    %444 = arith.mulf %435, %413 : vector<4x32xf32>
    %445 = arith.mulf %429, %437 : vector<4x32xf32>
    %446 = arith.addf %444, %445 : vector<4x32xf32>
    %447 = math.tanh %446 : vector<4x32xf32>
    %448 = arith.mulf %443, %447 : vector<4x32xf32>
    %cst_135 = arith.constant dense<0.000000e+00> : vector<4x256xf32>
    %449 = tpu.matmul %448, %315, %cst_135 {dimension_numbers = #tpu.dot_dimension_numbers<[1], [0], [0], [1], [0, 0, 1, 1], [], []>} : vector<4x32xf32>, vector<32x256xf32>, vector<4x256xf32> -> vector<4x256xf32>
    %450 = vector.extract_strided_slice %449 {offsets = [0, 0], sizes = [4, 128], strides = [1, 1]} : vector<4x256xf32> to vector<4x128xf32>
    %451 = vector.extract_strided_slice %449 {offsets = [0, 128], sizes = [4, 128], strides = [1, 1]} : vector<4x256xf32> to vector<4x128xf32>
    %452 = arith.select %2, %450, %451 : vector<4x128xi1>, vector<4x128xf32>
    %c8_136 = arith.constant 8 : index
    %c0_137 = arith.constant 0 : index
    %453 = vector.load %arg3[%c8_136, %c0_137] : memref<16x256xf32, #tpu.memory_space<vmem>>, vector<2x128xf32>
    %c6_138 = arith.constant 6 : index
    %c128_139 = arith.constant 128 : index
    %454 = vector.load %arg3[%c6_138, %c128_139] : memref<16x256xf32, #tpu.memory_space<vmem>>, vector<2x128xf32>
    %455 = tpu.concatenate %453, %454 in 0 : vector<2x128xf32>, vector<2x128xf32> -> vector<4x128xf32>
    %456 = arith.addf %452, %455 : vector<4x128xf32>
    %457 = vector.extract_strided_slice %456 {offsets = [0, 0], sizes = [4, 32], strides = [1, 1]} : vector<4x128xf32> to vector<4x32xf32>
    %458 = arith.negf %457 : vector<4x32xf32>
    %459 = math.exp %458 : vector<4x32xf32>
    %cst_140 = arith.constant 1.000000e+00 : f32
    %460 = vector.broadcast %cst_140 : f32 to vector<4x32xf32>
    %461 = arith.addf %460, %459 : vector<4x32xf32>
    %462 = arith.divf %460, %461 : vector<4x32xf32>
    %463 = vector.extract_strided_slice %456 {offsets = [0, 32], sizes = [4, 32], strides = [1, 1]} : vector<4x128xf32> to vector<4x32xf32>
    %464 = arith.negf %463 : vector<4x32xf32>
    %465 = math.exp %464 : vector<4x32xf32>
    %cst_141 = arith.constant 1.000000e+00 : f32
    %466 = vector.broadcast %cst_141 : f32 to vector<4x32xf32>
    %467 = arith.addf %466, %465 : vector<4x32xf32>
    %468 = arith.divf %466, %467 : vector<4x32xf32>
    %469 = vector.extract_strided_slice %456 {offsets = [0, 64], sizes = [4, 32], strides = [1, 1]} : vector<4x128xf32> to vector<4x32xf32>
    %470 = math.tanh %469 : vector<4x32xf32>
    %471 = vector.extract_strided_slice %456 {offsets = [0, 96], sizes = [4, 32], strides = [1, 1]} : vector<4x128xf32> to vector<4x32xf32>
    %472 = arith.negf %471 : vector<4x32xf32>
    %473 = math.exp %472 : vector<4x32xf32>
    %cst_142 = arith.constant 1.000000e+00 : f32
    %474 = vector.broadcast %cst_142 : f32 to vector<4x32xf32>
    %475 = arith.addf %474, %473 : vector<4x32xf32>
    %476 = arith.divf %474, %475 : vector<4x32xf32>
    %477 = arith.mulf %468, %446 : vector<4x32xf32>
    %478 = arith.mulf %462, %470 : vector<4x32xf32>
    %479 = arith.addf %477, %478 : vector<4x32xf32>
    %480 = math.tanh %479 : vector<4x32xf32>
    %481 = arith.mulf %476, %480 : vector<4x32xf32>
    %cst_143 = arith.constant dense<0.000000e+00> : vector<4x256xf32>
    %482 = tpu.matmul %481, %315, %cst_143 {dimension_numbers = #tpu.dot_dimension_numbers<[1], [0], [0], [1], [0, 0, 1, 1], [], []>} : vector<4x32xf32>, vector<32x256xf32>, vector<4x256xf32> -> vector<4x256xf32>
    %483 = vector.extract_strided_slice %482 {offsets = [0, 0], sizes = [4, 128], strides = [1, 1]} : vector<4x256xf32> to vector<4x128xf32>
    %484 = vector.extract_strided_slice %482 {offsets = [0, 128], sizes = [4, 128], strides = [1, 1]} : vector<4x256xf32> to vector<4x128xf32>
    %485 = arith.select %2, %483, %484 : vector<4x128xi1>, vector<4x128xf32>
    %c10_144 = arith.constant 10 : index
    %c0_145 = arith.constant 0 : index
    %486 = vector.load %arg3[%c10_144, %c0_145] : memref<16x256xf32, #tpu.memory_space<vmem>>, vector<2x128xf32>
    %c4_146 = arith.constant 4 : index
    %c128_147 = arith.constant 128 : index
    %487 = vector.load %arg3[%c4_146, %c128_147] : memref<16x256xf32, #tpu.memory_space<vmem>>, vector<2x128xf32>
    %488 = tpu.concatenate %486, %487 in 0 : vector<2x128xf32>, vector<2x128xf32> -> vector<4x128xf32>
    %489 = arith.addf %485, %488 : vector<4x128xf32>
    %490 = vector.extract_strided_slice %489 {offsets = [0, 0], sizes = [4, 32], strides = [1, 1]} : vector<4x128xf32> to vector<4x32xf32>
    %491 = arith.negf %490 : vector<4x32xf32>
    %492 = math.exp %491 : vector<4x32xf32>
    %cst_148 = arith.constant 1.000000e+00 : f32
    %493 = vector.broadcast %cst_148 : f32 to vector<4x32xf32>
    %494 = arith.addf %493, %492 : vector<4x32xf32>
    %495 = arith.divf %493, %494 : vector<4x32xf32>
    %496 = vector.extract_strided_slice %489 {offsets = [0, 32], sizes = [4, 32], strides = [1, 1]} : vector<4x128xf32> to vector<4x32xf32>
    %497 = arith.negf %496 : vector<4x32xf32>
    %498 = math.exp %497 : vector<4x32xf32>
    %cst_149 = arith.constant 1.000000e+00 : f32
    %499 = vector.broadcast %cst_149 : f32 to vector<4x32xf32>
    %500 = arith.addf %499, %498 : vector<4x32xf32>
    %501 = arith.divf %499, %500 : vector<4x32xf32>
    %502 = vector.extract_strided_slice %489 {offsets = [0, 64], sizes = [4, 32], strides = [1, 1]} : vector<4x128xf32> to vector<4x32xf32>
    %503 = math.tanh %502 : vector<4x32xf32>
    %504 = vector.extract_strided_slice %489 {offsets = [0, 96], sizes = [4, 32], strides = [1, 1]} : vector<4x128xf32> to vector<4x32xf32>
    %505 = arith.negf %504 : vector<4x32xf32>
    %506 = math.exp %505 : vector<4x32xf32>
    %cst_150 = arith.constant 1.000000e+00 : f32
    %507 = vector.broadcast %cst_150 : f32 to vector<4x32xf32>
    %508 = arith.addf %507, %506 : vector<4x32xf32>
    %509 = arith.divf %507, %508 : vector<4x32xf32>
    %510 = arith.mulf %501, %479 : vector<4x32xf32>
    %511 = arith.mulf %495, %503 : vector<4x32xf32>
    %512 = arith.addf %510, %511 : vector<4x32xf32>
    %513 = math.tanh %512 : vector<4x32xf32>
    %514 = arith.mulf %509, %513 : vector<4x32xf32>
    %cst_151 = arith.constant dense<0.000000e+00> : vector<4x256xf32>
    %515 = tpu.matmul %514, %315, %cst_151 {dimension_numbers = #tpu.dot_dimension_numbers<[1], [0], [0], [1], [0, 0, 1, 1], [], []>} : vector<4x32xf32>, vector<32x256xf32>, vector<4x256xf32> -> vector<4x256xf32>
    %516 = vector.extract_strided_slice %515 {offsets = [0, 0], sizes = [4, 128], strides = [1, 1]} : vector<4x256xf32> to vector<4x128xf32>
    %517 = vector.extract_strided_slice %515 {offsets = [0, 128], sizes = [4, 128], strides = [1, 1]} : vector<4x256xf32> to vector<4x128xf32>
    %518 = arith.select %2, %516, %517 : vector<4x128xi1>, vector<4x128xf32>
    %c12_152 = arith.constant 12 : index
    %c0_153 = arith.constant 0 : index
    %519 = vector.load %arg3[%c12_152, %c0_153] : memref<16x256xf32, #tpu.memory_space<vmem>>, vector<2x128xf32>
    %c2_154 = arith.constant 2 : index
    %c128_155 = arith.constant 128 : index
    %520 = vector.load %arg3[%c2_154, %c128_155] : memref<16x256xf32, #tpu.memory_space<vmem>>, vector<2x128xf32>
    %521 = tpu.concatenate %519, %520 in 0 : vector<2x128xf32>, vector<2x128xf32> -> vector<4x128xf32>
    %522 = arith.addf %518, %521 : vector<4x128xf32>
    %523 = vector.extract_strided_slice %522 {offsets = [0, 0], sizes = [4, 32], strides = [1, 1]} : vector<4x128xf32> to vector<4x32xf32>
    %524 = arith.negf %523 : vector<4x32xf32>
    %525 = math.exp %524 : vector<4x32xf32>
    %cst_156 = arith.constant 1.000000e+00 : f32
    %526 = vector.broadcast %cst_156 : f32 to vector<4x32xf32>
    %527 = arith.addf %526, %525 : vector<4x32xf32>
    %528 = arith.divf %526, %527 : vector<4x32xf32>
    %529 = vector.extract_strided_slice %522 {offsets = [0, 32], sizes = [4, 32], strides = [1, 1]} : vector<4x128xf32> to vector<4x32xf32>
    %530 = arith.negf %529 : vector<4x32xf32>
    %531 = math.exp %530 : vector<4x32xf32>
    %cst_157 = arith.constant 1.000000e+00 : f32
    %532 = vector.broadcast %cst_157 : f32 to vector<4x32xf32>
    %533 = arith.addf %532, %531 : vector<4x32xf32>
    %534 = arith.divf %532, %533 : vector<4x32xf32>
    %535 = vector.extract_strided_slice %522 {offsets = [0, 64], sizes = [4, 32], strides = [1, 1]} : vector<4x128xf32> to vector<4x32xf32>
    %536 = math.tanh %535 : vector<4x32xf32>
    %537 = vector.extract_strided_slice %522 {offsets = [0, 96], sizes = [4, 32], strides = [1, 1]} : vector<4x128xf32> to vector<4x32xf32>
    %538 = arith.negf %537 : vector<4x32xf32>
    %539 = math.exp %538 : vector<4x32xf32>
    %cst_158 = arith.constant 1.000000e+00 : f32
    %540 = vector.broadcast %cst_158 : f32 to vector<4x32xf32>
    %541 = arith.addf %540, %539 : vector<4x32xf32>
    %542 = arith.divf %540, %541 : vector<4x32xf32>
    %543 = arith.mulf %534, %512 : vector<4x32xf32>
    %544 = arith.mulf %528, %536 : vector<4x32xf32>
    %545 = arith.addf %543, %544 : vector<4x32xf32>
    %546 = math.tanh %545 : vector<4x32xf32>
    %547 = arith.mulf %542, %546 : vector<4x32xf32>
    %cst_159 = arith.constant dense<0.000000e+00> : vector<4x256xf32>
    %548 = tpu.matmul %547, %315, %cst_159 {dimension_numbers = #tpu.dot_dimension_numbers<[1], [0], [0], [1], [0, 0, 1, 1], [], []>} : vector<4x32xf32>, vector<32x256xf32>, vector<4x256xf32> -> vector<4x256xf32>
    %549 = vector.extract_strided_slice %548 {offsets = [0, 0], sizes = [4, 128], strides = [1, 1]} : vector<4x256xf32> to vector<4x128xf32>
    %550 = vector.extract_strided_slice %548 {offsets = [0, 128], sizes = [4, 128], strides = [1, 1]} : vector<4x256xf32> to vector<4x128xf32>
    %551 = arith.select %2, %549, %550 : vector<4x128xi1>, vector<4x128xf32>
    %c14_160 = arith.constant 14 : index
    %c0_161 = arith.constant 0 : index
    %552 = vector.load %arg3[%c14_160, %c0_161] : memref<16x256xf32, #tpu.memory_space<vmem>>, vector<2x128xf32>
    %c0_162 = arith.constant 0 : index
    %c128_163 = arith.constant 128 : index
    %553 = vector.load %arg3[%c0_162, %c128_163] : memref<16x256xf32, #tpu.memory_space<vmem>>, vector<2x128xf32>
    %554 = tpu.concatenate %552, %553 in 0 : vector<2x128xf32>, vector<2x128xf32> -> vector<4x128xf32>
    %555 = arith.addf %551, %554 : vector<4x128xf32>
    %556 = vector.extract_strided_slice %555 {offsets = [0, 0], sizes = [4, 32], strides = [1, 1]} : vector<4x128xf32> to vector<4x32xf32>
    %557 = arith.negf %556 : vector<4x32xf32>
    %558 = math.exp %557 : vector<4x32xf32>
    %cst_164 = arith.constant 1.000000e+00 : f32
    %559 = vector.broadcast %cst_164 : f32 to vector<4x32xf32>
    %560 = arith.addf %559, %558 : vector<4x32xf32>
    %561 = arith.divf %559, %560 : vector<4x32xf32>
    %562 = vector.extract_strided_slice %555 {offsets = [0, 32], sizes = [4, 32], strides = [1, 1]} : vector<4x128xf32> to vector<4x32xf32>
    %563 = arith.negf %562 : vector<4x32xf32>
    %564 = math.exp %563 : vector<4x32xf32>
    %cst_165 = arith.constant 1.000000e+00 : f32
    %565 = vector.broadcast %cst_165 : f32 to vector<4x32xf32>
    %566 = arith.addf %565, %564 : vector<4x32xf32>
    %567 = arith.divf %565, %566 : vector<4x32xf32>
    %568 = vector.extract_strided_slice %555 {offsets = [0, 64], sizes = [4, 32], strides = [1, 1]} : vector<4x128xf32> to vector<4x32xf32>
    %569 = math.tanh %568 : vector<4x32xf32>
    %570 = vector.extract_strided_slice %555 {offsets = [0, 96], sizes = [4, 32], strides = [1, 1]} : vector<4x128xf32> to vector<4x32xf32>
    %571 = arith.negf %570 : vector<4x32xf32>
    %572 = math.exp %571 : vector<4x32xf32>
    %cst_166 = arith.constant 1.000000e+00 : f32
    %573 = vector.broadcast %cst_166 : f32 to vector<4x32xf32>
    %574 = arith.addf %573, %572 : vector<4x32xf32>
    %575 = arith.divf %573, %574 : vector<4x32xf32>
    %576 = arith.mulf %567, %545 : vector<4x32xf32>
    %577 = arith.mulf %561, %569 : vector<4x32xf32>
    %578 = arith.addf %576, %577 : vector<4x32xf32>
    %579 = math.tanh %578 : vector<4x32xf32>
    %580 = arith.mulf %575, %579 : vector<4x32xf32>
    %581 = vector.extract_strided_slice %580 {offsets = [0, 0], sizes = [2, 32], strides = [1, 1]} : vector<4x32xf32> to vector<2x32xf32>
    %582 = tpu.concatenate %581, %349 in 1 : vector<2x32xf32>, vector<2x32xf32> -> vector<2x64xf32>
    %c176 = arith.constant 176 : index
    %c0_167 = arith.constant 0 : index
    %583 = vector.load %arg1[%c176, %c0_167] : memref<248x256xf32, #tpu.memory_space<vmem>>, vector<64x7xf32>
    %c240 = arith.constant 240 : index
    %c0_168 = arith.constant 0 : index
    %584 = vector.load %arg1[%c240, %c0_168] : memref<248x256xf32, #tpu.memory_space<vmem>>, vector<1x7xf32>
    %cst_169 = arith.constant dense<0.000000e+00> : vector<2x7xf32>
    %585 = tpu.matmul %582, %583, %cst_169 {dimension_numbers = #tpu.dot_dimension_numbers<[1], [0], [0], [1], [0, 0, 1, 1], [], []>} : vector<2x64xf32>, vector<64x7xf32>, vector<2x7xf32> -> vector<2x7xf32>
    %586 = vector.broadcast %584 : vector<1x7xf32> to vector<2x7xf32>
    %587 = arith.addf %585, %586 : vector<2x7xf32>
    %c0_170 = arith.constant 0 : index
    %c0_171 = arith.constant 0 : index
    %588 = vector.load %arg2[%c0_170, %c0_171] : memref<2x7xf32, #tpu.memory_space<vmem>>, vector<2x7xf32>
    tpu.vector_store %arg2[%c0_170, %c0_171], %587 {strides = array<i32>} : memref<2x7xf32, #tpu.memory_space<vmem>>, vector<2x7xf32>,
    return
  }
  func.func @transform_0(%arg0: i32) -> (i32, i32) {
    %c0_i32 = arith.constant 0 : i32
    %c0_i32_0 = arith.constant 0 : i32
    %c0_i32_1 = arith.constant 0 : i32
    return %c0_i32, %c0_i32_0 : i32, i32
  }
  func.func @transform_1(%arg0: i32) -> (i32, i32) {
    %c0_i32 = arith.constant 0 : i32
    %c0_i32_0 = arith.constant 0 : i32
    %c0_i32_1 = arith.constant 0 : i32
    return %c0_i32, %c0_i32_0 : i32, i32
  }
}

</mosaic_0001>

<bundles_post_ra>
// kernel: tpu_custom_call.1
= control target key start
LH: loop header
LB: loop body
LE: loop exit
PB: predicated region body
PF: predicated region fallthrough
CT: control target
= control target key end

     0   :  { %6 = vsyncpa [#allocation5], 0  ;;  %s2844_s0 = inlined_call_operand.hbm [shape: f32[248,256], index: 0, kind: input, shape index: {}]   ;;  %s2845_s1 = inlined_call_operand.hbm [shape: f32[2,7], index: 1, kind: output, shape index: {}]  }
   0x1   :  { %7 = vsyncpa [#allocation6], 0  ;;  %s2419_s6 = smov [#allocation4]  }
   0x2   :  { %s13_s7 = sshll.u32 %s2419_s6, 4  ;;  %s14_s7 = int_to_ptr.vmem [resolvable:$true] %s13_s7 }
   0x3   :  { %s2383_s8 = scalar_lea.vmem %s14_s7, 7936  ;;  %p2388_p1 = scmp.lt.s32.totalorder %s14_s7, %s14_s7 }
   0x4   :  { %p2384_p0 = scmp.ne.s32.totalorder %s14_s7, %s2383_s8  ;;  %p2389_p2 = scmp.lt.s32.totalorder %s2383_s8, %s2383_s8 }
   0x6   :  { %p2390_p3 = por %p2389_p2, %p2388_p1 }
   0x8   :  { %p2391_p4 = pnand %p2390_p3, %p2384_p0 }
   0xa   :  { %2394 = shalt.err (!%p2391_p4)
}
   0xb   :  { %s2420_s9 = smov 256   ;;  %s2421_s10 = smov 16  }
   0xc   :  { %19 = dma.hbm_to_vmem [thread:$0]  %s2844_s0, 7936, %s14_s7, [#allocation5], %s2420_s9, %s2420_s9, %s2421_s10  }
   0xd   :  { %2415 = dma.done.wait [#allocation5], 7936  }
   0xe   :  { %2416 = vsyncadd [#allocation5], 4294959360  ;;  %v2422_v0 = vmov 0.0   ;;  %v31_v1 = vld [vmem:[#allocation4 + $0x38] sm:$0xff]  ;;  %v30_v2 = vld [vmem:[#allocation4 + $0x30] sm:$0xff]  ;;  %vm45_vm0 = vcmask 130048   ;;  %v23_v15 = vlaneseq }
   0xf   :  { %116 = vmatprep.mubr.f32.mxu0 %v2422_v0  ;;  %443 = vmatprep.mubr.f32.mxu1 %v2422_v0  ;;  %v29_v3 = vld [vmem:[#allocation4 + $0x28] sm:$0xff]  ;;  %v28_v4 = vld [vmem:[#allocation4 + $0x20] sm:$0xff]  ;;  %v2442_v6 = vld [vmem:[#allocation4 + $0x78] sm:$0xff]  ;;  %vm222_vm2 = vcmask 1041408   ;;  %s2423_s0 = smov 64   ;;  %s2424_s13 = smov 32  }
  0x10   :  { %80 = vmatprep.subr.mxu0 %v31_v1  ;;  %v26_v5 = vld [vmem:[#allocation4] sm:$0xff]  ;;  %v2444_v7 = vld [vmem:[#allocation4 + $0x70] sm:$0xff]  ;;  %403 = vmatprep.subr.mxu1 %v2442_v6  ;;  %v2447_v8 = vld [vmem:[#allocation4 + $0x68] sm:$0xff]  ;;  %v2490_v16 = vshrl.u32 %v23_v15, 7  ;;  %vm253_vm3 = vcmask 254976   ;;  %vm141_vm4 = vcmask 261120  }
  0x11   :  { %81 = vmatpush1.msra.mxu0 %v30_v2  ;;  %404 = vmatpush1.msra.mxu1 %v2444_v7  ;;  %v2452_v9 = vld [vmem:[#allocation4 + $0x60] sm:$0xff]  ;;  %v27_v10 = vld [vmem:[#allocation4 + $0x10] sm:$0xff]  ;;  %v2456_v11 = vld [vmem:[#allocation4 + $0x58] sm:$0xff]  ;;  %vm258_vm5 = vcmask 519426   ;;  %vm1101_vm6 = vcmask 523264   ;;  %vm2425_vm7 = vmmov 0  }
  0x12   :  { %82 = vmatprep.subr.mxu0 %v29_v3  ;;  %v2459_v12 = vld [vmem:[#allocation4 + $0x50] sm:$0xff]  ;;  %405 = vmatprep.subr.mxu1 %v2447_v8  ;;  %v2463_v13 = vld [vmem:[#allocation4 + $0x48] sm:$0xff]  ;;  %v2468_v14 = vld [vmem:[#allocation4 + $0x40] sm:$0xff]  ;;  %v37_v17 = vsub.s32 0, %v2490_v16  ;;  %v41_v19 = vsub.s32 1, %v2490_v16  ;;  %vm25_vm1 = vcmp.lt.s32.totalorder %v2490_v16, 2 }
  0x13   :  { %83 = vmatpush1.msra.mxu0 %v28_v4  ;;  %406 = vmatpush1.msra.mxu1 %v2452_v9  ;;  %v33_v18 = vld [vmem:[#allocation4 + $0x80] ss:$8 sm:$0x3]  ;;  %s2426_s14 = smov [#allocation7]   ;;  %vm2159_vm8 = vcmask 50176  }
  0x14   :  { %2176 = vmatmul.mubr.msk.f32.vlgmr.msra.gmra.mxu0 %vm45_vm0, %v26_v5  ;;  %169 = vmatprep.subr.mxu0 %v2442_v6  ;;  %v38_v20 = vrot.slane %v33_v18, %v37_v17  ;;  %v42_v21 = vrot.slane %v33_v18, %v41_v19  ;;  %s2167_s15 = sshll.u32 %s2426_s14, 4  ;;  %s2168_s15 = int_to_ptr.vmem [resolvable:$true] %s2167_s15 }
  0x15   :  { %122 = vmatprep.mubr.f32.mxu0 %v2422_v0  ;;  %170 = vmatpush1.msra.mxu0 %v2444_v7  ;;  %s2395_s16 = scalar_lea.vmem %s2168_s15, 32  ;;  %p2400_p6 = scmp.lt.s32.totalorder %s2168_s15, %s2168_s15 }
  0x16   :  { %171 = vmatprep.subr.mxu0 %v2447_v8  ;;  %407 = vmatprep.subr.mxu1 %v2456_v11  ;;  %p2396_p5 = scmp.ne.s32.totalorder %s2168_s15, %s2395_s16  ;;  %p2401_p7 = scmp.lt.s32.totalorder %s2395_s16, %s2395_s16 }
  0x17   :  { %172 = vmatpush1.msra.mxu0 %v2452_v9  ;;  %408 = vmatpush1.msra.mxu1 %v2459_v12 }
  0x18   :  { %2177 = vmatmul.mubr.msk.f32.gmra.mxu0 %vm45_vm0, %v27_v10  ;;  %173 = vmatprep.subr.mxu0 %v2456_v11  ;;  %p2402_p8 = por %p2401_p7, %p2400_p6 }
  0x19   :  { %174 = vmatpush1.msra.mxu0 %v2459_v12  ;;  %209 = vmatprep.mubr.f32.mxu0 %v2422_v0 }
  0x1a   :  { %175 = vmatprep.subr.mxu0 %v2463_v13  ;;  %409 = vmatprep.subr.mxu1 %v2463_v13  ;;  %p2403_p9 = pnand %p2402_p8, %p2396_p5 }
  0x1b   :  { %176 = vmatpush1.msra.mxu0 %v2468_v14  ;;  %410 = vmatpush1.msra.mxu1 %v2468_v14 }
  0x1c   :  { %210 = vmatmul.mubr.f32.vlgmr.msra.gmra.mxu0 %v2422_v0  ;;  %286 = vmatprep.subr.mxu0 %v2442_v6 }
  0x1d   :  { %287 = vmatpush1.msra.mxu0 %v2444_v7  ;;  %326 = vmatprep.mubr.f32.mxu0 %v2422_v0 }
  0x1e   :  { %288 = vmatprep.subr.mxu0 %v2447_v8  ;;  %634 = vmatprep.subr.mxu1 %v2442_v6 }
  0x1f   :  { %289 = vmatpush1.msra.mxu0 %v2452_v9 }
  0x20   :  { %290 = vmatprep.subr.mxu0 %v2456_v11 }
  0x21   :  { %291 = vmatpush1.msra.mxu0 %v2459_v12 }
  0x22   :  { %292 = vmatprep.subr.mxu0 %v2463_v13 }
  0x23   :  { %293 = vmatpush1.msra.mxu0 %v2468_v14 }
  0x24   :  { %517 = vmatprep.subr.mxu0 %v2442_v6 }
  0xd4   :  { %v118_v22 = vpop.f32.mrf.mxu0 }
  0xd5   :  { %v119_v23 = vadd.f32 %v118_v22, %v38_v20 }
  0xd6   :  { %v120_v24 = vpop.f32.mrf.mxu0 }
  0xd7   :  { %129 = vst [vmem:[#allocation2 + $0x10] sm:$0xff] %v119_v23  ;;  %v121_v25 = vadd.f32 %v120_v24, %v42_v21 }
  0xd8   :  { %v124_v26 = vpop.f32.mrf.mxu0 }
  0xd9   :  { %130 = vst [vmem:[#allocation2] sm:$0xff] %v121_v25  ;;  %v125_v27 = vadd.f32 %v124_v26, %v38_v20 }
  0xda   :  { %v126_v28 = vpop.f32.mrf.mxu0 }
  0xdb   :  { %131 = vst [vmem:[#allocation2 + $0x18] sm:$0xff] %v125_v27  ;;  %v127_v29 = vadd.f32 %v126_v28, %v42_v21 }
  0xdc   :  { %v211_v30 = vpop.f32.mrf.mxu0 }
  0xdd   :  { %132 = vst [vmem:[#allocation2 + $0x8] sm:$0xff] %v127_v29 }
  0xde   :  { %v213_v31 = vpop.f32.mrf.mxu0  ;;  %v217_v34 = vld [vmem:[#allocation2 + $0x10] sm:$0x3]  ;;  %v334_v53 = vld [vmem:[#allocation2 + $0x10] sm:$0xc]  ;;  %v451_v23 = vld [vmem:[#allocation2 + $0x10] sm:$0x30] }
  0xdf   :  { %v216_v35 = vsel %vm25_vm1, %v211_v30, %v213_v31  ;;  %v337_v56 = vrot.slane %v334_v53, 2  ;;  %v454_v26 = vrot.slane %v451_v23, 4 }
  0xe4   :  { %v218_v32 = vld [vmem:[#allocation2 + $0x8] sm:$0xc0]  ;;  %v335_v52 = vld [vmem:[#allocation2 + $0x8] sm:$0x30]  ;;  %v452_v25 = vld [vmem:[#allocation2 + $0x8] sm:$0xc] }
  0xe5   :  { %v220_v33 = vrot.slane %v218_v32, 4  ;;  %v340_v54 = vrot.slane %v335_v52, 2  ;;  %v456_v29 = vsel %vm222_vm2, %v454_v26, %v452_v25 }
  0xe7   :  { %v223_v36 = vsel %vm222_vm2, %v217_v34, %v220_v33  ;;  %v342_v59 = vsel %vm222_vm2, %v337_v56, %v340_v54 }
  0xe8   :  { %v224_v37 = vadd.f32 %v223_v36, %v216_v35 }
  0xea   :  { %2247 = vtanh.f32 %v224_v37  ;;  %v2178_v39 = vmul.f32 -1.442695, %v224_v37 }
  0xec   :  { %2249 = vpow2.f32 %v2178_v39 }
  0xf7   :  { %v2248_v38 = vpop.eup %2247 }
  0xf8   :  { %234 = vrot.lane.b32.xlu0 %v2248_v38, %s2423_s0 }
  0xf9   :  { %v2250_v40 = vpop.eup %2249 }
  0xfa   :  { %v228_v41 = vadd.f32 1.0, %v2250_v40 }
  0xfc   :  { %2251 = vrcp.f32 %v228_v41 }
 0x109   :  { %v2252_v42 = vpop.eup %2251 }
 0x10a   :  { %v232_v45 = vmul.f32 0.0, %v2252_v42 }
 0x16a   :  { %v235_v43 = vpop.permute.xlu0 %234 }
 0x16b   :  { %v237_v44 = vmul.f32 %v2252_v42, %v235_v43 }
 0x16d   :  { %239 = vrot.lane.b32.xlu0 %v237_v44, %s2424_s13 }
 0x1df   :  { %v240_v46 = vpop.permute.xlu0 %239 }
 0x1e0   :  { %v242_v47 = vadd.f32 %v240_v46, %v232_v45  ;;  %v566_v45 = vld [vmem:[#allocation2 + $0x8] sm:$0x3]  ;;  %v565_v46 = vld [vmem:[#allocation2 + $0x10] sm:$0xc0] }
 0x1e2   :  { %2253 = vtanh.f32 %v242_v47 }
 0x1ef   :  { %v2254_v48 = vpop.eup %2253 }
 0x1f0   :  { %245 = vrot.lane.b32.xlu1 %v2254_v48, %s2423_s0 }
 0x262   :  { %v246_v49 = vpop.permute.xlu1 %245 }
 0x263   :  { %v2505_v50 = vmul.f32 %v2252_v42, %v246_v49  ;;  %v568_v49 = vrot.slane %v565_v46, 6 }
 0x265   :  { %250 = vrot.lane.b32.xlu1 %v2505_v50, %s2424_s13 }
 0x2d7   :  { %v251_v51 = vpop.permute.xlu1 %250 }
 0x2d8   :  { %254 = vst.msk [vmem:[#allocation3] sm:$0x3] %vm253_vm3, %v251_v51  ;;  %2179 = vmatmul.mubr.msk.f32.vlgmr.msra.gmra.mxu0 %vm141_vm4, %v251_v51 }
 0x2d9   :  { %518 = vmatpush1.msra.mxu0 %v2444_v7  ;;  %557 = vmatprep.mubr.f32.mxu0 %v2422_v0 }
 0x2da   :  { %519 = vmatprep.subr.mxu0 %v2447_v8 }
 0x2db   :  { %520 = vmatpush1.msra.mxu0 %v2452_v9 }
 0x2dc   :  { %521 = vmatprep.subr.mxu0 %v2456_v11 }
 0x2dd   :  { %522 = vmatpush1.msra.mxu0 %v2459_v12 }
 0x2de   :  { %523 = vmatprep.subr.mxu0 %v2463_v13 }
 0x2df   :  { %524 = vmatpush1.msra.mxu0 %v2468_v14 }
 0x2e0   :  { %748 = vmatprep.subr.mxu0 %v2442_v6 }
 0x398   :  { %v328_v55 = vpop.f32.mrf.mxu0 }
 0x39a   :  { %v330_v57 = vpop.f32.mrf.mxu0 }
 0x39b   :  { %v333_v58 = vsel %vm25_vm1, %v328_v55, %v330_v57 }
 0x39c   :  { %v343_v60 = vadd.f32 %v342_v59, %v333_v58 }
 0x39e   :  { %2255 = vtanh.f32 %v343_v60  ;;  %v2180_v62 = vmul.f32 -1.442695, %v343_v60 }
 0x3a0   :  { %2257 = vpow2.f32 %v2180_v62 }
 0x3ab   :  { %v2256_v61 = vpop.eup %2255 }
 0x3ac   :  { %353 = vrot.lane.b32.xlu0 %v2256_v61, %s2423_s0 }
 0x3ad   :  { %v2258_v63 = vpop.eup %2257 }
 0x3ae   :  { %v347_v1 = vadd.f32 1.0, %v2258_v63 }
 0x3b0   :  { %2259 = vrcp.f32 %v347_v1 }
 0x3bd   :  { %v2260_v2 = vpop.eup %2259 }
 0x3be   :  { %v351_v5 = vmul.f32 %v2260_v2, %v242_v47  ;;  %v571_v47 = vrot.slane %v566_v45, 6 }
 0x3c0   :  { %v573_v53 = vsel %vm222_vm2, %v568_v49, %v571_v47 }
 0x41e   :  { %v354_v3 = vpop.permute.xlu0 %353 }
 0x41f   :  { %v356_v4 = vmul.f32 %v2260_v2, %v354_v3 }
 0x421   :  { %358 = vrot.lane.b32.xlu1 %v356_v4, %s2424_s13 }
 0x493   :  { %v359_v10 = vpop.permute.xlu1 %358 }
 0x494   :  { %v361_v15 = vadd.f32 %v359_v10, %v351_v5  ;;  %v683_v5 = vld [vmem:[#allocation2] sm:$0xc0] }
 0x495   :  { %v685_v10 = vrot.slane %v683_v5, 4 }
 0x496   :  { %2261 = vtanh.f32 %v361_v15 }
 0x4a3   :  { %v2262_v18 = vpop.eup %2261 }
 0x4a4   :  { %364 = vrot.lane.b32.xlu0 %v2262_v18, %s2423_s0  ;;  %v682_v18 = vld [vmem:[#allocation2 + $0x18] sm:$0x3] }
 0x4a5   :  { %v687_v23 = vsel %vm222_vm2, %v682_v18, %v685_v10 }
 0x516   :  { %v365_v20 = vpop.permute.xlu0 %364 }
 0x517   :  { %v2526_v21 = vmul.f32 %v2260_v2, %v365_v20 }
 0x519   :  { %369 = vrot.lane.b32.xlu1 %v2526_v21, %s2424_s13 }
 0x58b   :  { %v370_v22 = vpop.permute.xlu1 %369 }
 0x58c   :  { %372 = vst.msk [vmem:[#allocation3 + $0x2] sm:$0x3] %vm253_vm3, %v370_v22  ;;  %2181 = vmatmul.mubr.msk.f32.vlgmr.msra.gmra.mxu1 %vm141_vm4, %v370_v22 }
 0x58d   :  { %635 = vmatpush1.msra.mxu1 %v2444_v7  ;;  %674 = vmatprep.mubr.f32.mxu1 %v2422_v0 }
 0x58e   :  { %636 = vmatprep.subr.mxu1 %v2447_v8 }
 0x58f   :  { %637 = vmatpush1.msra.mxu1 %v2452_v9 }
 0x590   :  { %638 = vmatprep.subr.mxu1 %v2456_v11 }
 0x591   :  { %639 = vmatpush1.msra.mxu1 %v2459_v12 }
 0x592   :  { %640 = vmatprep.subr.mxu1 %v2463_v13 }
 0x593   :  { %641 = vmatpush1.msra.mxu1 %v2468_v14 }
 0x594   :  { %865 = vmatprep.subr.mxu1 %v2442_v6 }
 0x64c   :  { %v445_v24 = vpop.f32.mrf.mxu1 }
 0x64e   :  { %v447_v27 = vpop.f32.mrf.mxu1 }
 0x64f   :  { %v450_v28 = vsel %vm25_vm1, %v445_v24, %v447_v27 }
 0x650   :  { %v457_v30 = vadd.f32 %v456_v29, %v450_v28 }
 0x652   :  { %2263 = vtanh.f32 %v457_v30  ;;  %v2182_v32 = vmul.f32 -1.442695, %v457_v30 }
 0x654   :  { %2265 = vpow2.f32 %v2182_v32 }
 0x65f   :  { %v2264_v31 = vpop.eup %2263 }
 0x660   :  { %467 = vrot.lane.b32.xlu0 %v2264_v31, %s2423_s0 }
 0x661   :  { %v2266_v33 = vpop.eup %2265 }
 0x662   :  { %v461_v34 = vadd.f32 1.0, %v2266_v33 }
 0x664   :  { %2267 = vrcp.f32 %v461_v34 }
 0x671   :  { %v2268_v35 = vpop.eup %2267 }
 0x672   :  { %v465_v38 = vmul.f32 %v2268_v35, %v361_v15 }
 0x6d2   :  { %v468_v36 = vpop.permute.xlu0 %467 }
 0x6d3   :  { %v470_v37 = vmul.f32 %v2268_v35, %v468_v36 }
 0x6d5   :  { %472 = vrot.lane.b32.xlu1 %v470_v37, %s2424_s13 }
 0x747   :  { %v473_v39 = vpop.permute.xlu1 %472 }
 0x748   :  { %v475_v40 = vadd.f32 %v473_v39, %v465_v38  ;;  %v796_v39 = vld [vmem:[#allocation2 + $0x18] sm:$0xc] }
 0x74a   :  { %2269 = vtanh.f32 %v475_v40 }
 0x757   :  { %v2270_v41 = vpop.eup %2269 }
 0x758   :  { %478 = vrot.lane.b32.xlu0 %v2270_v41, %s2423_s0  ;;  %v799_v41 = vrot.slane %v796_v39, 2 }
 0x7ca   :  { %v479_v42 = vpop.permute.xlu0 %478 }
 0x7cb   :  { %v2547_v43 = vmul.f32 %v2268_v35, %v479_v42 }
 0x7cd   :  { %483 = vrot.lane.b32.xlu1 %v2547_v43, %s2424_s13 }
 0x83f   :  { %v484_v44 = vpop.permute.xlu1 %483 }
 0x840   :  { %486 = vst.msk [vmem:[#allocation3 + $0x4] sm:$0x3] %vm253_vm3, %v484_v44  ;;  %2183 = vmatmul.mubr.msk.f32.vlgmr.msra.gmra.mxu0 %vm141_vm4, %v484_v44 }
 0x841   :  { %749 = vmatpush1.msra.mxu0 %v2444_v7  ;;  %788 = vmatprep.mubr.f32.mxu0 %v2422_v0 }
 0x842   :  { %750 = vmatprep.subr.mxu0 %v2447_v8 }
 0x843   :  { %751 = vmatpush1.msra.mxu0 %v2452_v9 }
 0x844   :  { %752 = vmatprep.subr.mxu0 %v2456_v11 }
 0x845   :  { %753 = vmatpush1.msra.mxu0 %v2459_v12 }
 0x846   :  { %754 = vmatprep.subr.mxu0 %v2463_v13 }
 0x847   :  { %755 = vmatpush1.msra.mxu0 %v2468_v14 }
 0x848   :  { %979 = vmatprep.subr.mxu0 %v2442_v6 }
 0x900   :  { %v559_v48 = vpop.f32.mrf.mxu0 }
 0x902   :  { %v561_v51 = vpop.f32.mrf.mxu0 }
 0x903   :  { %v564_v52 = vsel %vm25_vm1, %v559_v48, %v561_v51 }
 0x904   :  { %v574_v54 = vadd.f32 %v573_v53, %v564_v52 }
 0x906   :  { %2271 = vtanh.f32 %v574_v54  ;;  %v2184_v56 = vmul.f32 -1.442695, %v574_v54 }
 0x908   :  { %2273 = vpow2.f32 %v2184_v56 }
 0x913   :  { %v2272_v55 = vpop.eup %2271 }
 0x914   :  { %584 = vrot.lane.b32.xlu0 %v2272_v55, %s2423_s0 }
 0x915   :  { %v2274_v57 = vpop.eup %2273 }
 0x916   :  { %v578_v6 = vadd.f32 1.0, %v2274_v57  ;;  %v913_v57 = vld [vmem:[#allocation2 + $0x18] sm:$0x30] }
 0x918   :  { %2275 = vrcp.f32 %v578_v6  ;;  %v916_v6 = vrot.slane %v913_v57, 4  ;;  %v1078_v57 = vld [vmem:[#allocation4 + $0xc0] sm:$0xff] }
 0x925   :  { %v2276_v58 = vpop.eup %2275 }
 0x926   :  { %v582_v61 = vmul.f32 %v2276_v58, %v475_v40  ;;  %v797_v40 = vld [vmem:[#allocation2] sm:$0x30] }
 0x927   :  { %v802_v44 = vrot.slane %v797_v40, 2 }
 0x986   :  { %v585_v59 = vpop.permute.xlu0 %584 }
 0x987   :  { %v587_v60 = vmul.f32 %v2276_v58, %v585_v59 }
 0x989   :  { %589 = vrot.lane.b32.xlu1 %v587_v60, %s2424_s13  ;;  %v914_v60 = vld [vmem:[#allocation2] sm:$0xc] }
 0x9fb   :  { %v590_v62 = vpop.permute.xlu1 %589 }
 0x9fc   :  { %v592_v63 = vadd.f32 %v590_v62, %v582_v61  ;;  %v918_v62 = vsel %vm222_vm2, %v916_v6, %v914_v60  ;;  %v1077_v6 = vld [vmem:[#allocation4 + $0xb8] sm:$0xff] }
 0x9fd   :  { %v1073_v60 = vld [vmem:[#allocation4 + $0x98] sm:$0xff] }
 0x9fe   :  { %2277 = vtanh.f32 %v592_v63 }
 0xa0b   :  { %v2278_v1 = vpop.eup %2277 }
 0xa0c   :  { %595 = vrot.lane.b32.xlu0 %v2278_v1, %s2423_s0 }
 0xa7e   :  { %v596_v2 = vpop.permute.xlu0 %595 }
 0xa7f   :  { %v2568_v3 = vmul.f32 %v2276_v58, %v596_v2 }
 0xa81   :  { %600 = vrot.lane.b32.xlu1 %v2568_v3, %s2424_s13 }
 0xaf3   :  { %v601_v4 = vpop.permute.xlu1 %600 }
 0xaf4   :  { %603 = vst.msk [vmem:[#allocation3 + $0x6] sm:$0x3] %vm253_vm3, %v601_v4  ;;  %2185 = vmatmul.mubr.msk.f32.vlgmr.msra.gmra.mxu1 %vm141_vm4, %v601_v4 }
 0xaf5   :  { %866 = vmatpush1.msra.mxu1 %v2444_v7  ;;  %905 = vmatprep.mubr.f32.mxu1 %v2422_v0 }
 0xaf6   :  { %867 = vmatprep.subr.mxu1 %v2447_v8 }
 0xaf7   :  { %868 = vmatpush1.msra.mxu1 %v2452_v9 }
 0xaf8   :  { %869 = vmatprep.subr.mxu1 %v2456_v11 }
 0xaf9   :  { %870 = vmatpush1.msra.mxu1 %v2459_v12 }
 0xafa   :  { %871 = vmatprep.subr.mxu1 %v2463_v13 }
 0xafb   :  { %872 = vmatpush1.msra.mxu1 %v2468_v14 }
 0xbb4   :  { %v676_v15 = vpop.f32.mrf.mxu1 }
 0xbb6   :  { %v678_v20 = vpop.f32.mrf.mxu1 }
 0xbb7   :  { %v681_v22 = vsel %vm25_vm1, %v676_v15, %v678_v20 }
 0xbb8   :  { %v688_v24 = vadd.f32 %v687_v23, %v681_v22 }
 0xbba   :  { %2279 = vtanh.f32 %v688_v24  ;;  %v2186_v26 = vmul.f32 -1.442695, %v688_v24 }
 0xbbc   :  { %2281 = vpow2.f32 %v2186_v26 }
 0xbc7   :  { %v2280_v25 = vpop.eup %2279 }
 0xbc8   :  { %698 = vrot.lane.b32.xlu0 %v2280_v25, %s2423_s0 }
 0xbc9   :  { %v2282_v27 = vpop.eup %2281 }
 0xbca   :  { %v692_v28 = vadd.f32 1.0, %v2282_v27 }
 0xbcc   :  { %2283 = vrcp.f32 %v692_v28  ;;  %v1027_v28 = vld [vmem:[#allocation2 + $0x18] sm:$0xc0] }
 0xbd9   :  { %v2284_v29 = vpop.eup %2283 }
 0xbda   :  { %v696_v32 = vmul.f32 %v2284_v29, %v592_v63 }
 0xc3a   :  { %v699_v30 = vpop.permute.xlu0 %698 }
 0xc3b   :  { %v701_v31 = vmul.f32 %v2284_v29, %v699_v30  ;;  %v1030_v30 = vrot.slane %v1027_v28, 6 }
 0xc3d   :  { %703 = vrot.lane.b32.xlu1 %v701_v31, %s2424_s13 }
 0xcaf   :  { %v704_v33 = vpop.permute.xlu1 %703 }
 0xcb0   :  { %v706_v34 = vadd.f32 %v704_v33, %v696_v32 }
 0xcb2   :  { %2285 = vtanh.f32 %v706_v34 }
 0xcbf   :  { %v2286_v35 = vpop.eup %2285 }
 0xcc0   :  { %709 = vrot.lane.b32.xlu0 %v2286_v35, %s2423_s0 }
 0xd32   :  { %v710_v36 = vpop.permute.xlu0 %709 }
 0xd33   :  { %v2588_v37 = vmul.f32 %v2284_v29, %v710_v36  ;;  %v1028_v29 = vld [vmem:[#allocation2] sm:$0x3] }
 0xd34   :  { %v1033_v32 = vrot.slane %v1028_v29, 6 }
 0xd35   :  { %714 = vrot.lane.b32.xlu1 %v2588_v37, %s2424_s13 }
 0xd36   :  { %v1035_v35 = vsel %vm222_vm2, %v1030_v30, %v1033_v32 }
 0xda7   :  { %v2592_v38 = vpop.permute.xlu1 %714 }
 0xda8   :  { %2187 = vmatmul.mubr.msk.f32.vlgmr.msra.gmra.mxu0 %vm141_vm4, %v2592_v38 }
 0xda9   :  { %980 = vmatpush1.msra.mxu0 %v2444_v7  ;;  %1019 = vmatprep.mubr.f32.mxu0 %v2422_v0 }
 0xdaa   :  { %981 = vmatprep.subr.mxu0 %v2447_v8  ;;  %v804_v8 = vsel %vm222_vm2, %v799_v41, %v802_v44 }
 0xdab   :  { %982 = vmatpush1.msra.mxu0 %v2452_v9 }
 0xdac   :  { %983 = vmatprep.subr.mxu0 %v2456_v11 }
 0xdad   :  { %984 = vmatpush1.msra.mxu0 %v2459_v12 }
 0xdae   :  { %985 = vmatprep.subr.mxu0 %v2463_v13 }
 0xdaf   :  { %986 = vmatpush1.msra.mxu0 %v2468_v14 }
 0xe68   :  { %v790_v42 = vpop.f32.mrf.mxu0 }
 0xe6a   :  { %v792_v7 = vpop.f32.mrf.mxu0 }
 0xe6b   :  { %v795_v45 = vsel %vm25_vm1, %v790_v42, %v792_v7 }
 0xe6c   :  { %v805_v9 = vadd.f32 %v804_v8, %v795_v45 }
 0xe6e   :  { %2287 = vtanh.f32 %v805_v9  ;;  %v2188_v12 = vmul.f32 -1.442695, %v805_v9 }
 0xe70   :  { %2289 = vpow2.f32 %v2188_v12 }
 0xe7b   :  { %v2288_v11 = vpop.eup %2287 }
 0xe7c   :  { %815 = vrot.lane.b32.xlu0 %v2288_v11, %s2423_s0 }
 0xe7d   :  { %v2290_v13 = vpop.eup %2289 }
 0xe7e   :  { %v809_v14 = vadd.f32 1.0, %v2290_v13 }
 0xe80   :  { %2291 = vrcp.f32 %v809_v14  ;;  %v1087_v14 = vld [vmem:[#allocation4 + $0x108] sm:$0xff] }
 0xe81   :  { %1124 = vmatprep.subr.mxu1 %v1087_v14 }
 0xe8d   :  { %v2292_v46 = vpop.eup %2291 }
 0xe8e   :  { %v813_v49 = vmul.f32 %v2292_v46, %v706_v34 }
 0xeee   :  { %v816_v47 = vpop.permute.xlu0 %815 }
 0xeef   :  { %v818_v48 = vmul.f32 %v2292_v46, %v816_v47  ;;  %v1084_v47 = vld [vmem:[#allocation4 + $0xf0] sm:$0xff] }
 0xef1   :  { %820 = vrot.lane.b32.xlu1 %v818_v48, %s2424_s13 }
 0xf63   :  { %v821_v51 = vpop.permute.xlu1 %820 }
 0xf64   :  { %v823_v52 = vadd.f32 %v821_v51, %v813_v49  ;;  %v1082_v51 = vld [vmem:[#allocation4 + $0xe0] sm:$0xff] }
 0xf66   :  { %2293 = vtanh.f32 %v823_v52 }
 0xf73   :  { %v2294_v53 = vpop.eup %2293 }
 0xf74   :  { %826 = vrot.lane.b32.xlu0 %v2294_v53, %s2423_s0  ;;  %v1080_v53 = vld [vmem:[#allocation4 + $0xd0] sm:$0xff] }
 0xfe6   :  { %v827_v54 = vpop.permute.xlu0 %826 }
 0xfe7   :  { %v2610_v55 = vmul.f32 %v2292_v46, %v827_v54  ;;  %v1086_v46 = vld [vmem:[#allocation4 + $0x100] sm:$0xff]  ;;  %v1079_v54 = vld [vmem:[#allocation4 + $0xc8] sm:$0xff] }
 0xfe9   :  { %831 = vrot.lane.b32.xlu1 %v2610_v55, %s2424_s13 }
0x105b   :  { %v2614_v56 = vpop.permute.xlu1 %831 }
0x105c   :  { %2189 = vmatmul.mubr.msk.f32.vlgmr.msra.gmra.mxu1 %vm141_vm4, %v2614_v56 }
0x105d   :  { %1172 = vmatprep.mubr.f32.mxu1 %v2422_v0  ;;  %1125 = vmatpush1.msra.mxu1 %v1086_v46 }
0x111c   :  { %v907_v58 = vpop.f32.mrf.mxu1 }
0x111e   :  { %v909_v59 = vpop.f32.mrf.mxu1 }
0x111f   :  { %v912_v61 = vsel %vm25_vm1, %v907_v58, %v909_v59  ;;  %v1076_v58 = vld [vmem:[#allocation4 + $0xb0] sm:$0xff]  ;;  %v1074_v59 = vld [vmem:[#allocation4 + $0xa0] sm:$0xff] }
0x1120   :  { %v919_v63 = vadd.f32 %v918_v62, %v912_v61  ;;  %v1072_v61 = vld [vmem:[#allocation4 + $0x90] sm:$0xff] }
0x1122   :  { %2295 = vtanh.f32 %v919_v63  ;;  %v2190_v2 = vmul.f32 -1.442695, %v919_v63  ;;  %v2658_v63 = vld [vmem:[#allocation4 + $0x140] sm:$0xff] }
0x1124   :  { %2297 = vpow2.f32 %v2190_v2 }
0x112f   :  { %v2296_v1 = vpop.eup %2295 }
0x1130   :  { %929 = vrot.lane.b32.xlu0 %v2296_v1, %s2423_s0  ;;  %v2660_v1 = vld [vmem:[#allocation4 + $0x138] sm:$0xff] }
0x1131   :  { %v2298_v4 = vpop.eup %2297 }
0x1132   :  { %v923_v5 = vadd.f32 1.0, %v2298_v4  ;;  %v2663_v4 = vld [vmem:[#allocation4 + $0x130] sm:$0xff] }
0x1134   :  { %2299 = vrcp.f32 %v923_v5  ;;  %v2668_v5 = vld [vmem:[#allocation4 + $0x128] sm:$0xff] }
0x1141   :  { %v2300_v10 = vpop.eup %2299 }
0x1142   :  { %v927_v20 = vmul.f32 %v2300_v10, %v823_v52  ;;  %v1081_v52 = vld [vmem:[#allocation4 + $0xd8] sm:$0xff] }
0x11a2   :  { %v930_v15 = vpop.permute.xlu0 %929 }
0x11a3   :  { %v932_v18 = vmul.f32 %v2300_v10, %v930_v15  ;;  %v2676_v15 = vld [vmem:[#allocation4 + $0x118] sm:$0xff] }
0x11a5   :  { %934 = vrot.lane.b32.xlu1 %v932_v18, %s2424_s13 }
0x1217   :  { %v935_v22 = vpop.permute.xlu1 %934 }
0x1218   :  { %v937_v23 = vadd.f32 %v935_v22, %v927_v20  ;;  %v2679_v20 = vld [vmem:[#allocation4 + $0x110] sm:$0xff] }
0x121a   :  { %2301 = vtanh.f32 %v937_v23 }
0x1227   :  { %v2302_v24 = vpop.eup %2301 }
0x1228   :  { %940 = vrot.lane.b32.xlu0 %v2302_v24, %s2423_s0 }
0x129a   :  { %v941_v25 = vpop.permute.xlu0 %940 }
0x129b   :  { %v943_v26 = vmul.f32 %v2300_v10, %v941_v25  ;;  %v2671_v10 = vld [vmem:[#allocation4 + $0x120] sm:$0xff] }
0x129d   :  { %945 = vrot.lane.b32.xlu1 %v943_v26, %s2424_s13 }
0x130f   :  { %v2626_v27 = vpop.permute.xlu1 %945 }
0x1310   :  { %2191 = vmatmul.mubr.msk.f32.vlgmr.msra.gmra.mxu0 %vm141_vm4, %v2626_v27 }
0x1311   :  { %1261 = vmatprep.mubr.f32.mxu0 %v2422_v0 }
0x13d0   :  { %v1021_v31 = vpop.f32.mrf.mxu0 }
0x13d2   :  { %v1023_v33 = vpop.f32.mrf.mxu0 }
0x13d3   :  { %v1026_v34 = vsel %vm25_vm1, %v1021_v31, %v1023_v33 }
0x13d4   :  { %v1036_v36 = vadd.f32 %v1035_v35, %v1026_v34 }
0x13d6   :  { %2303 = vtanh.f32 %v1036_v36  ;;  %v2192_v40 = vmul.f32 -1.442695, %v1036_v36 }
0x13d8   :  { %2305 = vpow2.f32 %v2192_v40 }
0x13e3   :  { %v2304_v39 = vpop.eup %2303 }
0x13e4   :  { %1046 = vrot.lane.b32.xlu0 %v2304_v39, %s2423_s0 }
0x13e5   :  { %v2306_v41 = vpop.eup %2305 }
0x13e6   :  { %v1040_v42 = vadd.f32 1.0, %v2306_v41 }
0x13e8   :  { %2307 = vrcp.f32 %v1040_v42 }
0x13f5   :  { %v2308_v44 = vpop.eup %2307 }
0x13f6   :  { %v1044_v8 = vmul.f32 %v2308_v44, %v937_v23 }
0x1456   :  { %v1047_v7 = vpop.permute.xlu0 %1046 }
0x1457   :  { %v1049_v45 = vmul.f32 %v2308_v44, %v1047_v7 }
0x1459   :  { %1051 = vrot.lane.b32.xlu1 %v1049_v45, %s2424_s13 }
0x145d   :  { %718 = vrot.lane.b32.xlu1 %v2588_v37, %s2423_s0 }
0x1461   :  { %949 = vrot.lane.b32.xlu1 %v943_v26, %s2423_s0 }
0x1465   :  { %255 = vrot.lane.b32.xlu1 %v2505_v50, %s2423_s0  ;;  %v1085_v50 = vld [vmem:[#allocation4 + $0xf8] sm:$0xff] }
0x1466   :  { %1126 = vmatprep.subr.mxu1 %v1085_v50 }
0x1467   :  { %1127 = vmatpush1.msra.mxu1 %v1084_v47 }
0x1469   :  { %487 = vrot.lane.b32.xlu1 %v2547_v43, %s2423_s0  ;;  %v1083_v43 = vld [vmem:[#allocation4 + $0xe8] sm:$0xff] }
0x146a   :  { %1128 = vmatprep.subr.mxu1 %v1083_v43 }
0x146b   :  { %1129 = vmatpush1.msra.mxu1 %v1082_v51 }
0x146c   :  { %1130 = vmatprep.subr.mxu1 %v1081_v52 }
0x146d   :  { %1131 = vmatpush1.msra.mxu1 %v1080_v53 }
0x146e   :  { %1132 = vmatprep.subr.mxu1 %v1079_v54 }
0x146f   :  { %1133 = vmatpush1.msra.mxu1 %v1078_v57 }
0x1470   :  { %1134 = vmatprep.subr.mxu1 %v1077_v6 }
0x1471   :  { %1135 = vmatpush1.msra.mxu1 %v1076_v58 }
0x14cb   :  { %v1052_v9 = vpop.permute.xlu1 %1051 }
0x14cc   :  { %v1054_v11 = vadd.f32 %v1052_v9, %v1044_v8 }
0x14ce   :  { %2309 = vtanh.f32 %v1054_v11 }
0x14cf   :  { %v719_v12 = vpop.permute.xlu1 %718 }
0x14d0   :  { %721 = vst.msk [vmem:[#allocation3 + $0x4] sm:$0xc] %vm258_vm5, %v719_v12 }
0x14d3   :  { %v950_v13 = vpop.permute.xlu1 %949 }
0x14d4   :  { %952 = vst.msk [vmem:[#allocation3] sm:$0xc] %vm258_vm5, %v950_v13 }
0x14d7   :  { %v256_v37 = vpop.permute.xlu1 %255 }
0x14d8   :  { %259 = vst.msk [vmem:[#allocation3 + $0xc] sm:$0xc] %vm258_vm5, %v256_v37 }
0x14db   :  { %v2310_v48 = vpop.eup %2309  ;;  %v488_v49 = vpop.permute.xlu1 %487 }
0x14dc   :  { %490 = vst.msk [vmem:[#allocation3 + $0x8] sm:$0xc] %vm258_vm5, %v488_v49  ;;  %1057 = vrot.lane.b32.xlu0 %v2310_v48, %s2423_s0 }
0x14dd   :  { %834 = vst.msk [vmem:[#allocation3 + $0xa] sm:$0x3] %vm253_vm3, %v2614_v56  ;;  %v1075_v56 = vld [vmem:[#allocation4 + $0xa8] sm:$0xff] }
0x14de   :  { %1136 = vmatprep.subr.mxu1 %v1075_v56 }
0x14df   :  { %1137 = vmatpush1.msra.mxu1 %v1074_v59 }
0x14e0   :  { %835 = vrot.lane.b32.xlu0 %v2610_v55, %s2423_s0  ;;  %1138 = vmatprep.subr.mxu1 %v1073_v60 }
0x14e1   :  { %1139 = vmatpush1.msra.mxu1 %v1072_v61 }
0x14e4   :  { %373 = vrot.lane.b32.xlu0 %v2526_v21, %s2423_s0  ;;  %v2656_v21 = vld [vmem:[#allocation4 + $0x148] sm:$0xff] }
0x14e5   :  { %1221 = vmatprep.subr.mxu0 %v2656_v21  ;;  %1440 = vmatprep.subr.mxu1 %v2656_v21 }
0x14e6   :  { %1222 = vmatpush1.msra.mxu0 %v2658_v63 }
0x14e7   :  { %1223 = vmatprep.subr.mxu0 %v2660_v1 }
0x14e8   :  { %1224 = vmatpush1.msra.mxu0 %v2663_v4 }
0x14e9   :  { %1225 = vmatprep.subr.mxu0 %v2668_v5 }
0x14ea   :  { %1226 = vmatpush1.msra.mxu0 %v2671_v10 }
0x14eb   :  { %1227 = vmatprep.subr.mxu0 %v2676_v15 }
0x14ec   :  { %1228 = vmatpush1.msra.mxu0 %v2679_v20 }
0x14ed   :  { %1262 = vmatmul.mubr.f32.vlgmr.msra.gmra.mxu0 %v2422_v0  ;;  %1329 = vmatprep.subr.mxu0 %v2656_v21 }
0x14ee   :  { %1330 = vmatpush1.msra.mxu0 %v2658_v63  ;;  %1369 = vmatprep.mubr.f32.mxu0 %v2422_v0 }
0x14ef   :  { %1331 = vmatprep.subr.mxu0 %v2660_v1 }
0x14f0   :  { %1332 = vmatpush1.msra.mxu0 %v2663_v4 }
0x14f1   :  { %1333 = vmatprep.subr.mxu0 %v2668_v5 }
0x14f2   :  { %1334 = vmatpush1.msra.mxu0 %v2671_v10 }
0x14f3   :  { %1335 = vmatprep.subr.mxu0 %v2676_v15 }
0x14f4   :  { %1336 = vmatpush1.msra.mxu0 %v2679_v20 }
0x14f5   :  { %1548 = vmatprep.subr.mxu0 %v2656_v21 }
0x154e   :  { %v1058_v55 = vpop.permute.xlu0 %1057 }
0x154f   :  { %v1060_v62 = vmul.f32 %v2308_v44, %v1058_v55 }
0x1551   :  { %1062 = vrot.lane.b32.xlu1 %v1060_v62, %s2424_s13  ;;  %1066 = vrot.lane.b32.xlu0 %v1060_v62, %s2423_s0 }
0x1552   :  { %v836_v2 = vpop.permute.xlu0 %835 }
0x1553   :  { %838 = vst.msk [vmem:[#allocation3 + $0x2] sm:$0xc] %vm258_vm5, %v836_v2 }
0x1555   :  { %604 = vrot.lane.b32.xlu0 %v2568_v3, %s2423_s0 }
0x1556   :  { %v374_v18 = vpop.permute.xlu0 %373 }
0x1557   :  { %376 = vst.msk [vmem:[#allocation3 + $0xa] sm:$0xc] %vm258_vm5, %v374_v18 }
0x1558   :  { %948 = vst.msk [vmem:[#allocation3 + $0xc] sm:$0x3] %vm253_vm3, %v2626_v27 }
0x15ad   :  { %v1263_v36 = vpop.f32.mrf.mxu0 }
0x15af   :  { %v1265_v39 = vpop.f32.mrf.mxu0 }
0x15c3   :  { %v1063_v3 = vpop.permute.xlu1 %1062  ;;  %v1067_v22 = vpop.permute.xlu0 %1066 }
0x15c4   :  { %1065 = vst.msk [vmem:[#allocation3 + $0xe] sm:$0x3] %vm253_vm3, %v1063_v3 }
0x15c5   :  { %1069 = vst.msk [vmem:[#allocation3 - $0x2] sm:$0xc] %vm258_vm5, %v1067_v22 }
0x15c7   :  { %v605_v23 = vpop.permute.xlu0 %604 }
0x15c8   :  { %607 = vst.msk [vmem:[#allocation3 + $0x6] sm:$0xc] %vm258_vm5, %v605_v23 }
0x15c9   :  { %717 = vst.msk [vmem:[#allocation3 + $0x8] sm:$0x3] %vm253_vm3, %v2592_v38  ;;  %v1089_v38 = vld [vmem:[#allocation4 + $0x150] ss:$8 sm:$0x3] }
0x15ca   :  { %v1094_v26 = vrot.slane %v1089_v38, %v37_v17  ;;  %v1098_v27 = vrot.slane %v1089_v38, %v41_v19  ;;  %v1268_v19 = vsel %vm25_vm1, %v1263_v36, %v1265_v39 }
0x15cc   :  { %v1070_v24 = vld [vmem:[#allocation3] sm:$0xff] }
0x15cd   :  { %2193 = vmatmul.mubr.msk.f32.vlgmr.msra.gmra.mxu1 %vm1101_vm6, %v1070_v24 }
0x15ce   :  { %1178 = vmatprep.mubr.f32.mxu1 %v2422_v0  ;;  %1441 = vmatpush1.msra.mxu1 %v2658_v63 }
0x15cf   :  { %1442 = vmatprep.subr.mxu1 %v2660_v1 }
0x15d0   :  { %1443 = vmatpush1.msra.mxu1 %v2663_v4  ;;  %v1071_v25 = vld [vmem:[#allocation3 + $0x8] sm:$0xff] }
0x15d1   :  { %1444 = vmatprep.subr.mxu1 %v2668_v5  ;;  %2194 = vmatmul.mubr.msk.f32.gmra.mxu1 %vm1101_vm6, %v1071_v25 }
0x15d2   :  { %1445 = vmatpush1.msra.mxu1 %v2671_v10  ;;  %1480 = vmatprep.mubr.f32.mxu1 %v2422_v0 }
0x15d3   :  { %1446 = vmatprep.subr.mxu1 %v2676_v15 }
0x15d4   :  { %1447 = vmatpush1.msra.mxu1 %v2679_v20 }
0x15d5   :  { %1659 = vmatprep.subr.mxu1 %v2656_v21 }
0x168d   :  { %v1174_v28 = vpop.f32.mrf.mxu1 }
0x168e   :  { %v1175_v29 = vadd.f32 %v1174_v28, %v1094_v26 }
0x168f   :  { %v1176_v30 = vpop.f32.mrf.mxu1 }
0x1690   :  { %1185 = vst [vmem:[#allocation2 + $0x10] sm:$0xff] %v1175_v29  ;;  %v1177_v31 = vadd.f32 %v1176_v30, %v1098_v27 }
0x1691   :  { %v1180_v32 = vpop.f32.mrf.mxu1 }
0x1692   :  { %1186 = vst [vmem:[#allocation2] sm:$0xff] %v1177_v31  ;;  %v1181_v33 = vadd.f32 %v1180_v32, %v1094_v26 }
0x1693   :  { %v1182_v34 = vpop.f32.mrf.mxu1 }
0x1694   :  { %1187 = vst [vmem:[#allocation2 + $0x18] sm:$0xff] %v1181_v33  ;;  %v1183_v35 = vadd.f32 %v1182_v34, %v1098_v27 }
0x1696   :  { %1188 = vst [vmem:[#allocation2 + $0x8] sm:$0xff] %v1183_v35 }
0x1697   :  { %v1269_v17 = vld [vmem:[#allocation2 + $0x10] sm:$0x3]  ;;  %v1377_v51 = vld [vmem:[#allocation2 + $0x10] sm:$0xc]  ;;  %v1488_v27 = vld [vmem:[#allocation2 + $0x10] sm:$0x30] }
0x1698   :  { %v1380_v54 = vrot.slane %v1377_v51, 2  ;;  %v1491_v30 = vrot.slane %v1488_v27, 4 }
0x169d   :  { %v1270_v40 = vld [vmem:[#allocation2 + $0x8] sm:$0xc0]  ;;  %v1378_v49 = vld [vmem:[#allocation2 + $0x8] sm:$0x30]  ;;  %v1489_v29 = vld [vmem:[#allocation2 + $0x8] sm:$0xc] }
0x169e   :  { %v1272_v41 = vrot.slane %v1270_v40, 4  ;;  %v1383_v52 = vrot.slane %v1378_v49, 2  ;;  %v1493_v33 = vsel %vm222_vm2, %v1491_v30, %v1489_v29 }
0x16a0   :  { %v1274_v42 = vsel %vm222_vm2, %v1269_v17, %v1272_v41  ;;  %v1385_v58 = vsel %vm222_vm2, %v1380_v54, %v1383_v52 }
0x16a1   :  { %v1275_v44 = vadd.f32 %v1274_v42, %v1268_v19 }
0x16a3   :  { %2311 = vtanh.f32 %v1275_v44  ;;  %v2195_v45 = vmul.f32 -1.442695, %v1275_v44 }
0x16a5   :  { %2313 = vpow2.f32 %v2195_v45 }
0x16b0   :  { %v2312_v7 = vpop.eup %2311 }
0x16b1   :  { %1285 = vrot.lane.b32.xlu0 %v2312_v7, %s2423_s0 }
0x16b2   :  { %v2314_v8 = vpop.eup %2313 }
0x16b3   :  { %v1279_v9 = vadd.f32 1.0, %v2314_v8 }
0x16b5   :  { %2315 = vrcp.f32 %v1279_v9 }
0x16c2   :  { %v2316_v11 = vpop.eup %2315 }
0x16c3   :  { %v1283_v37 = vmul.f32 0.0, %v2316_v11 }
0x1723   :  { %v1286_v12 = vpop.permute.xlu0 %1285 }
0x1724   :  { %v1288_v13 = vmul.f32 %v2316_v11, %v1286_v12  ;;  %v1597_v12 = vld [vmem:[#allocation2 + $0x8] sm:$0x3] }
0x1726   :  { %1290 = vrot.lane.b32.xlu1 %v1288_v13, %s2424_s13  ;;  %v1596_v13 = vld [vmem:[#allocation2 + $0x10] sm:$0xc0] }
0x1798   :  { %v1291_v14 = vpop.permute.xlu1 %1290 }
0x1799   :  { %v1293_v46 = vadd.f32 %v1291_v14, %v1283_v37  ;;  %v1602_v37 = vrot.slane %v1597_v12, 6 }
0x179b   :  { %2317 = vtanh.f32 %v1293_v46 }
0x17a8   :  { %v2318_v50 = vpop.eup %2317 }
0x17a9   :  { %1296 = vrot.lane.b32.xlu0 %v2318_v50, %s2423_s0 }
0x181b   :  { %v1297_v47 = vpop.permute.xlu0 %1296 }
0x181c   :  { %v2725_v43 = vmul.f32 %v2316_v11, %v1297_v47 }
0x181e   :  { %1301 = vrot.lane.b32.xlu1 %v2725_v43, %s2424_s13 }
0x1890   :  { %v1302_v48 = vpop.permute.xlu1 %1301 }
0x1891   :  { %2196 = vmatmul.mubr.msk.f32.vlgmr.msra.gmra.mxu0 %vm141_vm4, %v1302_v48 }
0x1892   :  { %1549 = vmatpush1.msra.mxu0 %v2658_v63  ;;  %1588 = vmatprep.mubr.f32.mxu0 %v2422_v0 }
0x1893   :  { %1550 = vmatprep.subr.mxu0 %v2660_v1 }
0x1894   :  { %1551 = vmatpush1.msra.mxu0 %v2663_v4 }
0x1895   :  { %1552 = vmatprep.subr.mxu0 %v2668_v5 }
0x1896   :  { %1553 = vmatpush1.msra.mxu0 %v2671_v10 }
0x1897   :  { %1554 = vmatprep.subr.mxu0 %v2676_v15 }
0x1898   :  { %1555 = vmatpush1.msra.mxu0 %v2679_v20 }
0x1899   :  { %1767 = vmatprep.subr.mxu0 %v2656_v21 }
0x1951   :  { %v1371_v53 = vpop.f32.mrf.mxu0 }
0x1953   :  { %v1373_v57 = vpop.f32.mrf.mxu0 }
0x1954   :  { %v1376_v6 = vsel %vm25_vm1, %v1371_v53, %v1373_v57 }
0x1955   :  { %v1386_v56 = vadd.f32 %v1385_v58, %v1376_v6 }
0x1957   :  { %2319 = vtanh.f32 %v1386_v56  ;;  %v2197_v60 = vmul.f32 -1.442695, %v1386_v56 }
0x1959   :  { %2321 = vpow2.f32 %v2197_v60 }
0x1964   :  { %v2320_v59 = vpop.eup %2319 }
0x1965   :  { %1396 = vrot.lane.b32.xlu0 %v2320_v59, %s2423_s0 }
0x1966   :  { %v2322_v61 = vpop.eup %2321 }
0x1967   :  { %v1390_v55 = vadd.f32 1.0, %v2322_v61 }
0x1969   :  { %2323 = vrcp.f32 %v1390_v55 }
0x1976   :  { %v2324_v62 = vpop.eup %2323 }
0x1977   :  { %v1394_v3 = vmul.f32 %v2324_v62, %v1293_v46  ;;  %v1599_v46 = vrot.slane %v1596_v13, 6 }
0x1979   :  { %v1604_v48 = vsel %vm222_vm2, %v1599_v46, %v1602_v37 }
0x19d7   :  { %v1397_v2 = vpop.permute.xlu0 %1396 }
0x19d8   :  { %v1399_v18 = vmul.f32 %v2324_v62, %v1397_v2  ;;  %v1708_v2 = vld [vmem:[#allocation2] sm:$0xc0] }
0x19da   :  { %1401 = vrot.lane.b32.xlu1 %v1399_v18, %s2424_s13  ;;  %v1710_v18 = vrot.slane %v1708_v2, 4 }
0x1a4c   :  { %v1402_v22 = vpop.permute.xlu1 %1401 }
0x1a4d   :  { %v1404_v23 = vadd.f32 %v1402_v22, %v1394_v3  ;;  %v1707_v22 = vld [vmem:[#allocation2 + $0x18] sm:$0x3] }
0x1a4f   :  { %2325 = vtanh.f32 %v1404_v23 }
0x1a5c   :  { %v2326_v24 = vpop.eup %2325 }
0x1a5d   :  { %1407 = vrot.lane.b32.xlu0 %v2326_v24, %s2423_s0 }
0x1acf   :  { %v1408_v25 = vpop.permute.xlu0 %1407 }
0x1ad0   :  { %v1410_v38 = vmul.f32 %v2324_v62, %v1408_v25  ;;  %v1712_v25 = vsel %vm222_vm2, %v1707_v22, %v1710_v18 }
0x1ad2   :  { %1412 = vrot.lane.b32.xlu1 %v1410_v38, %s2424_s13 }
0x1b44   :  { %v1413_v26 = vpop.permute.xlu1 %1412 }
0x1b45   :  { %2198 = vmatmul.mubr.msk.f32.vlgmr.msra.gmra.mxu1 %vm141_vm4, %v1413_v26 }
0x1b46   :  { %1660 = vmatpush1.msra.mxu1 %v2658_v63  ;;  %1699 = vmatprep.mubr.f32.mxu1 %v2422_v0 }
0x1b47   :  { %1661 = vmatprep.subr.mxu1 %v2660_v1 }
0x1b48   :  { %1662 = vmatpush1.msra.mxu1 %v2663_v4 }
0x1b49   :  { %1663 = vmatprep.subr.mxu1 %v2668_v5 }
0x1b4a   :  { %1664 = vmatpush1.msra.mxu1 %v2671_v10 }
0x1b4b   :  { %1665 = vmatprep.subr.mxu1 %v2676_v15 }
0x1b4c   :  { %1666 = vmatpush1.msra.mxu1 %v2679_v20 }
0x1b4d   :  { %1878 = vmatprep.subr.mxu1 %v2656_v21 }
0x1c05   :  { %v1482_v28 = vpop.f32.mrf.mxu1 }
0x1c07   :  { %v1484_v31 = vpop.f32.mrf.mxu1 }
0x1c08   :  { %v1487_v32 = vsel %vm25_vm1, %v1482_v28, %v1484_v31 }
0x1c09   :  { %v1494_v34 = vadd.f32 %v1493_v33, %v1487_v32 }
0x1c0b   :  { %2327 = vtanh.f32 %v1494_v34  ;;  %v2199_v36 = vmul.f32 -1.442695, %v1494_v34 }
0x1c0d   :  { %2329 = vpow2.f32 %v2199_v36 }
0x1c18   :  { %v2328_v35 = vpop.eup %2327 }
0x1c19   :  { %1504 = vrot.lane.b32.xlu0 %v2328_v35, %s2423_s0 }
0x1c1a   :  { %v2330_v39 = vpop.eup %2329 }
0x1c1b   :  { %v1498_v40 = vadd.f32 1.0, %v2330_v39 }
0x1c1d   :  { %2331 = vrcp.f32 %v1498_v40 }
0x1c2a   :  { %v2332_v41 = vpop.eup %2331 }
0x1c2b   :  { %v1502_v42 = vmul.f32 %v2332_v41, %v1404_v23 }
0x1c8b   :  { %v1505_v17 = vpop.permute.xlu0 %1504 }
0x1c8c   :  { %v1507_v19 = vmul.f32 %v2332_v41, %v1505_v17  ;;  %v1815_v17 = vld [vmem:[#allocation2 + $0x18] sm:$0xc] }
0x1c8e   :  { %1509 = vrot.lane.b32.xlu1 %v1507_v19, %s2424_s13  ;;  %v1816_v19 = vld [vmem:[#allocation2] sm:$0x30] }
0x1d00   :  { %v1510_v44 = vpop.permute.xlu1 %1509 }
0x1d01   :  { %v1512_v7 = vadd.f32 %v1510_v44, %v1502_v42  ;;  %v1818_v42 = vrot.slane %v1815_v17, 2 }
0x1d03   :  { %2333 = vtanh.f32 %v1512_v7 }
0x1d10   :  { %v2334_v45 = vpop.eup %2333 }
0x1d11   :  { %1515 = vrot.lane.b32.xlu0 %v2334_v45, %s2423_s0 }
0x1d83   :  { %v1516_v8 = vpop.permute.xlu0 %1515 }
0x1d84   :  { %v1518_v9 = vmul.f32 %v2332_v41, %v1516_v8 }
0x1d86   :  { %1520 = vrot.lane.b32.xlu1 %v1518_v9, %s2424_s13 }
0x1df8   :  { %v1521_v11 = vpop.permute.xlu1 %1520 }
0x1df9   :  { %2200 = vmatmul.mubr.msk.f32.vlgmr.msra.gmra.mxu0 %vm141_vm4, %v1521_v11 }
0x1dfa   :  { %1768 = vmatpush1.msra.mxu0 %v2658_v63  ;;  %1807 = vmatprep.mubr.f32.mxu0 %v2422_v0 }
0x1dfb   :  { %1769 = vmatprep.subr.mxu0 %v2660_v1 }
0x1dfc   :  { %1770 = vmatpush1.msra.mxu0 %v2663_v4 }
0x1dfd   :  { %1771 = vmatprep.subr.mxu0 %v2668_v5 }
0x1dfe   :  { %1772 = vmatpush1.msra.mxu0 %v2671_v10 }
0x1dff   :  { %1773 = vmatprep.subr.mxu0 %v2676_v15 }
0x1e00   :  { %1774 = vmatpush1.msra.mxu0 %v2679_v20 }
0x1e01   :  { %1986 = vmatprep.subr.mxu0 %v2656_v21 }
0x1eb9   :  { %v1590_v14 = vpop.f32.mrf.mxu0 }
0x1ebb   :  { %v1592_v50 = vpop.f32.mrf.mxu0 }
0x1ebc   :  { %v1595_v47 = vsel %vm25_vm1, %v1590_v14, %v1592_v50 }
0x1ebd   :  { %v1605_v49 = vadd.f32 %v1604_v48, %v1595_v47  ;;  %v1926_v48 = vld [vmem:[#allocation2 + $0x18] sm:$0x30] }
0x1ebf   :  { %2335 = vtanh.f32 %v1605_v49  ;;  %v2201_v52 = vmul.f32 -1.442695, %v1605_v49  ;;  %v1929_v49 = vrot.slane %v1926_v48, 4 }
0x1ec1   :  { %2337 = vpow2.f32 %v2201_v52 }
0x1ecc   :  { %v2336_v51 = vpop.eup %2335 }
0x1ecd   :  { %1615 = vrot.lane.b32.xlu0 %v2336_v51, %s2423_s0 }
0x1ece   :  { %v2338_v53 = vpop.eup %2337 }
0x1ecf   :  { %v1609_v21 = vadd.f32 1.0, %v2338_v53  ;;  %v1927_v53 = vld [vmem:[#allocation2] sm:$0xc] }
0x1ed1   :  { %2339 = vrcp.f32 %v1609_v21 }
0x1ede   :  { %v2340_v54 = vpop.eup %2339 }
0x1edf   :  { %v1613_v58 = vmul.f32 %v2340_v54, %v1512_v7  ;;  %v1821_v7 = vrot.slane %v1816_v19, 2 }
0x1f3f   :  { %v1616_v57 = vpop.permute.xlu0 %1615 }
0x1f40   :  { %v1618_v6 = vmul.f32 %v2340_v54, %v1616_v57 }
0x1f42   :  { %1620 = vrot.lane.b32.xlu1 %v1618_v6, %s2424_s13 }
0x1fb4   :  { %v1621_v56 = vpop.permute.xlu1 %1620 }
0x1fb5   :  { %v1623_v59 = vadd.f32 %v1621_v56, %v1613_v58 }
0x1fb7   :  { %2341 = vtanh.f32 %v1623_v59 }
0x1fc4   :  { %v2342_v60 = vpop.eup %2341 }
0x1fc5   :  { %1626 = vrot.lane.b32.xlu0 %v2342_v60, %s2423_s0 }
0x2037   :  { %v1627_v61 = vpop.permute.xlu0 %1626 }
0x2038   :  { %v1629_v55 = vmul.f32 %v2340_v54, %v1627_v61  ;;  %v1931_v54 = vsel %vm222_vm2, %v1929_v49, %v1927_v53 }
0x203a   :  { %1631 = vrot.lane.b32.xlu1 %v1629_v55, %s2424_s13 }
0x20ac   :  { %v1632_v62 = vpop.permute.xlu1 %1631 }
0x20ad   :  { %2202 = vmatmul.mubr.msk.f32.vlgmr.msra.gmra.mxu1 %vm141_vm4, %v1632_v62 }
0x20ae   :  { %1879 = vmatpush1.msra.mxu1 %v2658_v63  ;;  %1918 = vmatprep.mubr.f32.mxu1 %v2422_v0 }
0x20af   :  { %1880 = vmatprep.subr.mxu1 %v2660_v1 }
0x20b0   :  { %1881 = vmatpush1.msra.mxu1 %v2663_v4 }
0x20b1   :  { %1882 = vmatprep.subr.mxu1 %v2668_v5 }
0x20b2   :  { %1883 = vmatpush1.msra.mxu1 %v2671_v10 }
0x20b3   :  { %1884 = vmatprep.subr.mxu1 %v2676_v15 }
0x20b4   :  { %1885 = vmatpush1.msra.mxu1 %v2679_v20 }
0x20b5   :  { %2220 = vmatprep.subr.mxu1 %v2422_v0 }
0x216d   :  { %v1701_v3 = vpop.f32.mrf.mxu1 }
0x216f   :  { %v1703_v23 = vpop.f32.mrf.mxu1 }
0x2170   :  { %v1706_v24 = vsel %vm25_vm1, %v1701_v3, %v1703_v23 }
0x2171   :  { %v1713_v38 = vadd.f32 %v1712_v25, %v1706_v24  ;;  %v2034_v25 = vld [vmem:[#allocation2 + $0x18] sm:$0xc0] }
0x2173   :  { %2343 = vtanh.f32 %v1713_v38  ;;  %v2203_v27 = vmul.f32 -1.442695, %v1713_v38  ;;  %v2035_v38 = vld [vmem:[#allocation2] sm:$0x3] }
0x2175   :  { %2345 = vpow2.f32 %v2203_v27 }
0x2180   :  { %v2344_v26 = vpop.eup %2343 }
0x2181   :  { %1723 = vrot.lane.b32.xlu0 %v2344_v26, %s2423_s0  ;;  %v2037_v26 = vrot.slane %v2034_v25, 6 }
0x2182   :  { %v2346_v28 = vpop.eup %2345 }
0x2183   :  { %v1717_v29 = vadd.f32 1.0, %v2346_v28  ;;  %v2040_v28 = vrot.slane %v2035_v38, 6 }
0x2185   :  { %2347 = vrcp.f32 %v1717_v29 }
0x2192   :  { %v2348_v30 = vpop.eup %2347 }
0x2193   :  { %v1721_v33 = vmul.f32 %v2348_v30, %v1623_v59 }
0x21f3   :  { %v1724_v31 = vpop.permute.xlu0 %1723 }
0x21f4   :  { %v1726_v32 = vmul.f32 %v2348_v30, %v1724_v31  ;;  %v2042_v31 = vsel %vm222_vm2, %v2037_v26, %v2040_v28 }
0x21f6   :  { %1728 = vrot.lane.b32.xlu1 %v1726_v32, %s2424_s13 }
0x2268   :  { %v1729_v34 = vpop.permute.xlu1 %1728 }
0x2269   :  { %v1731_v35 = vadd.f32 %v1729_v34, %v1721_v33 }
0x226b   :  { %2349 = vtanh.f32 %v1731_v35 }
0x2278   :  { %v2350_v36 = vpop.eup %2349 }
0x2279   :  { %1734 = vrot.lane.b32.xlu0 %v2350_v36, %s2423_s0 }
0x22eb   :  { %v1735_v39 = vpop.permute.xlu0 %1734 }
0x22ec   :  { %v1737_v40 = vmul.f32 %v2348_v30, %v1735_v39 }
0x22ee   :  { %1739 = vrot.lane.b32.xlu1 %v1737_v40, %s2424_s13 }
0x2360   :  { %v1740_v41 = vpop.permute.xlu1 %1739 }
0x2361   :  { %2204 = vmatmul.mubr.msk.f32.vlgmr.msra.gmra.mxu0 %vm141_vm4, %v1740_v41 }
0x2362   :  { %1987 = vmatpush1.msra.mxu0 %v2658_v63  ;;  %2026 = vmatprep.mubr.f32.mxu0 %v2422_v0 }
0x2363   :  { %1988 = vmatprep.subr.mxu0 %v2660_v1  ;;  %v1823_v1 = vsel %vm222_vm2, %v1818_v42, %v1821_v7  ;;  %v2084_v42 = vld [vmem:[#allocation4 + $0x1d0] sm:$0xff] }
0x2364   :  { %1989 = vmatpush1.msra.mxu0 %v2663_v4  ;;  %v2082_v7 = vld [vmem:[#allocation4 + $0x1b0] sm:$0xff] }
0x2365   :  { %1990 = vmatprep.subr.mxu0 %v2668_v5 }
0x2366   :  { %1991 = vmatpush1.msra.mxu0 %v2671_v10 }
0x2367   :  { %1992 = vmatprep.subr.mxu0 %v2676_v15 }
0x2368   :  { %1993 = vmatpush1.msra.mxu0 %v2679_v20 }
0x2421   :  { %v1809_v44 = vpop.f32.mrf.mxu0 }
0x2423   :  { %v1811_v63 = vpop.f32.mrf.mxu0 }
0x2424   :  { %v1814_v45 = vsel %vm25_vm1, %v1809_v44, %v1811_v63  ;;  %v2083_v44 = vld [vmem:[#allocation4 + $0x1c0] sm:$0xff] }
0x2425   :  { %v1824_v4 = vadd.f32 %v1823_v1, %v1814_v45  ;;  %v2081_v63 = vld [vmem:[#allocation4 + $0x1a0] sm:$0xff]  ;;  %v2080_v45 = vld [vmem:[#allocation4 + $0x190] sm:$0xff] }
0x2426   :  { %v2079_v1 = vld [vmem:[#allocation4 + $0x180] sm:$0xff] }
0x2427   :  { %2351 = vtanh.f32 %v1824_v4  ;;  %v2205_v10 = vmul.f32 -1.442695, %v1824_v4 }
0x2429   :  { %2353 = vpow2.f32 %v2205_v10  ;;  %v2072_v10 = vrot.slane %v2725_v43, 2 }
0x2434   :  { %v2352_v5 = vpop.eup %2351 }
0x2435   :  { %1834 = vrot.lane.b32.xlu0 %v2352_v5, %s2423_s0  ;;  %v2078_v5 = vld [vmem:[#allocation4 + $0x170] sm:$0xff] }
0x2436   :  { %v2354_v15 = vpop.eup %2353 }
0x2437   :  { %v1828_v20 = vadd.f32 1.0, %v2354_v15  ;;  %v2077_v15 = vld [vmem:[#allocation4 + $0x160] sm:$0xff] }
0x2439   :  { %2355 = vrcp.f32 %v1828_v20 }
0x2446   :  { %v2356_v8 = vpop.eup %2355 }
0x2447   :  { %v1832_v12 = vmul.f32 %v2356_v8, %v1731_v35 }
0x24a7   :  { %v1835_v9 = vpop.permute.xlu0 %1834 }
0x24a8   :  { %v1837_v11 = vmul.f32 %v2356_v8, %v1835_v9 }
0x24aa   :  { %1839 = vrot.lane.b32.xlu1 %v1837_v11, %s2424_s13 }
0x251c   :  { %v1840_v13 = vpop.permute.xlu1 %1839 }
0x251d   :  { %v1842_v37 = vadd.f32 %v1840_v13, %v1832_v12  ;;  %v2085_v12 = vld [vmem:[#allocation4 + $0x1e0] ss:$0 sm:$0xff] }
0x251f   :  { %2357 = vtanh.f32 %v1842_v37 }
0x252c   :  { %v2358_v14 = vpop.eup %2357 }
0x252d   :  { %1845 = vrot.lane.b32.xlu0 %v2358_v14, %s2423_s0 }
0x259f   :  { %v1846_v46 = vpop.permute.xlu0 %1845 }
0x25a0   :  { %v1848_v50 = vmul.f32 %v2356_v8, %v1846_v46 }
0x25a2   :  { %1850 = vrot.lane.b32.xlu1 %v1848_v50, %s2424_s13 }
0x2614   :  { %v1851_v47 = vpop.permute.xlu1 %1850 }
0x2615   :  { %2206 = vmatmul.mubr.msk.f32.vlgmr.msra.gmra.mxu1 %vm141_vm4, %v1851_v47 }
0x2616   :  { %2221 = vmatpush3.msra.mxu1 %v2084_v42  ;;  %2236 = vmatprep.mubr.msk.f32.mxu1 %vm2425_vm7, %v2422_v0 }
0x2617   :  { %2222 = vmatprep.subr.mxu1 %v2422_v0 }
0x2618   :  { %2223 = vmatpush3.msra.mxu1 %v2083_v44 }
0x2619   :  { %2224 = vmatprep.subr.mxu1 %v2422_v0 }
0x261a   :  { %2225 = vmatpush3.msra.mxu1 %v2082_v7 }
0x261b   :  { %2226 = vmatprep.subr.mxu1 %v2422_v0 }
0x261c   :  { %2227 = vmatpush3.msra.mxu1 %v2081_v63 }
0x261d   :  { %2228 = vmatprep.subr.mxu1 %v2422_v0 }
0x261e   :  { %2229 = vmatpush3.msra.mxu1 %v2080_v45 }
0x261f   :  { %2230 = vmatprep.subr.mxu1 %v2422_v0 }
0x2620   :  { %2231 = vmatpush3.msra.mxu1 %v2079_v1 }
0x2621   :  { %2232 = vmatprep.subr.mxu1 %v2422_v0 }
0x2622   :  { %2233 = vmatpush3.msra.mxu1 %v2078_v5 }
0x2623   :  { %2234 = vmatprep.subr.mxu1 %v2422_v0 }
0x2624   :  { %2235 = vmatpush3.msra.mxu1 %v2077_v15 }
0x26d5   :  { %v1920_v51 = vpop.f32.mrf.mxu1 }
0x26d7   :  { %v1922_v52 = vpop.f32.mrf.mxu1 }
0x26d8   :  { %v1925_v21 = vsel %vm25_vm1, %v1920_v51, %v1922_v52 }
0x26d9   :  { %v1932_v57 = vadd.f32 %v1931_v54, %v1925_v21 }
0x26db   :  { %2359 = vtanh.f32 %v1932_v57  ;;  %v2207_v58 = vmul.f32 -1.442695, %v1932_v57 }
0x26dd   :  { %2361 = vpow2.f32 %v2207_v58 }
0x26e8   :  { %v2360_v6 = vpop.eup %2359 }
0x26e9   :  { %1942 = vrot.lane.b32.xlu0 %v2360_v6, %s2423_s0 }
0x26ea   :  { %v2362_v56 = vpop.eup %2361 }
0x26eb   :  { %v1936_v59 = vadd.f32 1.0, %v2362_v56 }
0x26ed   :  { %2363 = vrcp.f32 %v1936_v59 }
0x26fa   :  { %v2364_v60 = vpop.eup %2363 }
0x26fb   :  { %v1940_v62 = vmul.f32 %v2364_v60, %v1842_v37 }
0x275b   :  { %v1943_v61 = vpop.permute.xlu0 %1942 }
0x275c   :  { %v1945_v55 = vmul.f32 %v2364_v60, %v1943_v61 }
0x275e   :  { %1947 = vrot.lane.b32.xlu1 %v1945_v55, %s2424_s13 }
0x27d0   :  { %v1948_v2 = vpop.permute.xlu1 %1947 }
0x27d1   :  { %v1950_v18 = vadd.f32 %v1948_v2, %v1940_v62 }
0x27d3   :  { %2365 = vtanh.f32 %v1950_v18 }
0x27e0   :  { %v2366_v3 = vpop.eup %2365 }
0x27e1   :  { %1953 = vrot.lane.b32.xlu0 %v2366_v3, %s2423_s0 }
0x2853   :  { %v1954_v22 = vpop.permute.xlu0 %1953 }
0x2854   :  { %v1956_v23 = vmul.f32 %v2364_v60, %v1954_v22 }
0x2856   :  { %1958 = vrot.lane.b32.xlu1 %v1956_v23, %s2424_s13 }
0x28c8   :  { %v1959_v24 = vpop.permute.xlu1 %1958 }
0x28c9   :  { %2208 = vmatmul.mubr.msk.f32.vlgmr.msra.gmra.mxu0 %vm141_vm4, %v1959_v24 }
0x2989   :  { %v2028_v27 = vpop.f32.mrf.mxu0 }
0x298b   :  { %v2030_v29 = vpop.f32.mrf.mxu0 }
0x298c   :  { %v2033_v30 = vsel %vm25_vm1, %v2028_v27, %v2030_v29 }
0x298d   :  { %v2043_v32 = vadd.f32 %v2042_v31, %v2033_v30 }
0x298f   :  { %2367 = vtanh.f32 %v2043_v32  ;;  %v2209_v34 = vmul.f32 -1.442695, %v2043_v32 }
0x2991   :  { %2369 = vpow2.f32 %v2209_v34 }
0x299c   :  { %v2368_v33 = vpop.eup %2367 }
0x299d   :  { %2053 = vrot.lane.b32.xlu0 %v2368_v33, %s2423_s0 }
0x299e   :  { %v2370_v35 = vpop.eup %2369 }
0x299f   :  { %v2047_v36 = vadd.f32 1.0, %v2370_v35 }
0x29a1   :  { %2371 = vrcp.f32 %v2047_v36 }
0x29ae   :  { %v2372_v39 = vpop.eup %2371 }
0x29af   :  { %v2051_v17 = vmul.f32 %v2372_v39, %v1950_v18 }
0x2a0f   :  { %v2054_v40 = vpop.permute.xlu0 %2053 }
0x2a10   :  { %v2056_v41 = vmul.f32 %v2372_v39, %v2054_v40 }
0x2a12   :  { %2058 = vrot.lane.b32.xlu1 %v2056_v41, %s2424_s13 }
0x2a84   :  { %v2059_v16 = vpop.permute.xlu1 %2058 }
0x2a85   :  { %v2061_v19 = vadd.f32 %v2059_v16, %v2051_v17 }
0x2a87   :  { %2373 = vtanh.f32 %v2061_v19 }
0x2a94   :  { %v2374_v4 = vpop.eup %2373 }
0x2a95   :  { %2064 = vrot.lane.b32.xlu0 %v2374_v4, %s2423_s0 }
0x2a99   :  { %2073 = vrot.lane.b32.xlu0 %v2072_v10, %s2423_s0 }
0x2b07   :  { %v2065_v20 = vpop.permute.xlu0 %2064 }
0x2b08   :  { %v2067_v8 = vmul.f32 %v2372_v39, %v2065_v20 }
0x2b0a   :  { %2069 = vrot.lane.b32.xlu1 %v2067_v8, %s2424_s13 }
0x2b0b   :  { %v2074_v9 = vpop.permute.xlu0 %2073 }
0x2b7c   :  { %v2070_v11 = vpop.permute.xlu1 %2069 }
0x2b7d   :  { %v2076_v43 = vsel %vm141_vm4, %v2070_v11, %v2074_v9 }
0x2b7e   :  { %2237 = vmatmul.mubr.msk.f32.vlgmr.msra.gmra.mxu1 %vm1101_vm6, %v2076_v43 }
0x2c3e   :  { %v2155_v13 = vpop.f32.mrf.mxu1 }
0x2c3f   :  { %v2156_v37 = vadd.f32 %v2155_v13, %v2085_v12 }
0x2c40   :  { %v2238_v14 = vpop.f32.mrf.mxu1 }
0x2c41   :  { %2160 = vst.msk [vmem:[#allocation7] sm:$0x3] %vm2159_vm8, %v2156_v37 }
0x2c42   :  { %2406 = shalt.err (!%p2403_p9)
}
0x2c43   :  { %2170 = dma.vmem_to_hbm [thread:$0]  %s2168_s15, 32, %s2845_s1, [#allocation6]  }
0x2c44   :  { %2417 = dma.done.wait [#allocation6], 32  }
0x2c45   :  { %2418 = vsyncadd [#allocation6], 4294967264 }
0x2c46   :  { %2174 = vsyncpa [#allocation5], 1 }
0x2c47   :  { %2175 = vsyncpa [#allocation6], 1 }

</bundles_post_ra>
